<compile_context>
chip_gen: v6e
topology: v6e:2x2x1
jax: 0.10.0
libtpu: 0.0.40
codegen_flags: <defaults>
</compile_context>

<pallas_src>
import jax
import jax.numpy as jnp
from jax import lax
from jax.experimental import pallas as pl
from jax.experimental.pallas import tpu as pltpu

F32 = jnp.float32
BN_EPS = 1e-5


# ============================================================================
# Static layout of the packed parameter slab: rows of a (P, 128) f32 array.
# Every entry starts at lane 0 so all in-kernel loads are simple windows.
# ============================================================================
def _param_layout(C, C2, Lo):
    entries = [
        ("e_g0", 1), ("e_b0", 1), ("e_w", 3 * C), ("e_cb", 1),
        ("e_g1", 1), ("e_b1", 1),
    ]
    for lo in range(Lo):
        entries += [(f"w_mu{lo}", Lo * C2), (f"w_lv{lo}", Lo * C2),
                    (f"b_mu{lo}", 1), (f"b_lv{lo}", 1)]
    entries += [
        ("r_g0", 1), ("r_b0", 1), ("r_w", 3 * C2), ("r_cb", 1),
        ("r_g1", 1), ("r_b1", 1),
        ("d_g0", 1), ("d_b0", 1), ("d_w", 3 * C2), ("d_cb", 1),
        ("d_g1", 1), ("d_b1", 1),
    ]
    offs, r = {}, 0
    for name, rows in entries:
        offs[name] = r
        r += rows
    return offs, r


# ============================================================================
# Single fused kernel: encoder -> fc / reparametrization -> decoder.
# Activations live as (positions*batch, channels) slabs in l-major row order;
# only the packed data/param slabs and one (B_out, 128) result ever touch HBM.
# ============================================================================
def _build_kernel(B, C, C2, L, Lo, offs):
    assert Lo == 2 and L == 2 * Lo, "kernel specialized to the [1, 0] config"
    nb = B                      # one position shift == B rows in l-major order
    XROWS = L * B               # encoder activation rows

    def kernel(data_ref, par_ref, out_ref, pad_ref):
        def P(name, rows, cols, roff=0):
            r0 = offs[name] + roff
            return par_ref[r0:r0 + rows, 0:cols]

        def bn(blocks, gname, bname, cw):
            """Training-mode BatchNorm1d over all rows of all blocks
            (batch x positions on sublanes, channels on lanes).
            Single pass: sum & sum-of-squares, biased variance, eps=1e-5."""
            g, b = P(gname, 1, cw), P(bname, 1, cw)
            n = float(sum(v.shape[0] for v in blocks))
            s = sum(jnp.sum(v, axis=0, keepdims=True) for v in blocks)
            ss = sum(jnp.sum(v * v, axis=0, keepdims=True) for v in blocks)
            mean = s / n
            var = jnp.maximum(ss / n - mean * mean, 0.0)
            scale = lax.rsqrt(var + BN_EPS) * g
            shift = b - mean * scale
            return [v * scale + shift for v in blocks]

        def conv_relu(blocks, wname, bname, cin, cout):
            """Conv1d(k=3, s=1, p=1) + bias + ReLU on an l-major slab.
            The zero-padded slab lives in one shared VMEM scratch; because a
            position shift is a whole B-row block, each tap is a contiguous
            row window, so three small MXU matmuls accumulate the conv with
            no per-batch/per-row work and no cross-batch leakage."""
            rows = sum(v.shape[0] for v in blocks)
            zero = jnp.zeros((nb, cin), F32)
            pad_ref[0:nb, 0:cin] = zero                       # left padding
            pad_ref[nb + rows:rows + 2 * nb, 0:cin] = zero    # right padding
            r = nb
            for v in blocks:                                  # interior rows
                pad_ref[r:r + v.shape[0], 0:cin] = v
                r += v.shape[0]
            y = P(bname, 1, cout)                             # bias, broadcast
            for k in range(3):                                # taps k-1,k,k+1
                y = y + jnp.dot(pad_ref[k * nb:k * nb + rows, 0:cin],
                                P(wname, cin, cout, roff=k * cin),
                                preferred_element_type=F32)
            return jnp.maximum(y, 0.0)

        out_ref[...] = jnp.zeros(out_ref.shape, F32)

        # ---------------- Encoder: SingleLayer(C -> C2, pool=2) ------------
        x = data_ref[0:XROWS, 0:C]                     # (L*B, C), l-major rows
        (h,) = bn([x], "e_g0", "e_b0", C)
        y = conv_relu([h], "e_w", "e_cb", C, C2)       # (L*B, C2)
        pooled = [jnp.maximum(y[(2 * lo) * B:(2 * lo + 1) * B, :],
                              y[(2 * lo + 1) * B:(2 * lo + 2) * B, :])
                  for lo in range(Lo)]                 # MaxPool1d(2): VPU only
        enc = bn(pooled, "e_g1", "e_b1", C2)           # Lo blocks of (B, C2)

        # ---------------- fc + reparametrization ---------------------------
        # fc weights were pre-split in the wrapper into per-output-position
        # blocks whose rows already follow the kernel's (l, c) input order, so
        # no flatten / transpose / selection matmuls are needed, and z comes
        # out directly as the decoder's l-major row blocks.
        z_blocks = []
        for lo in range(Lo):
            mu = P(f"b_mu{lo}", 1, C2)
            lv = P(f"b_lv{lo}", 1, C2)
            for l in range(Lo):
                mu = mu + jnp.dot(enc[l], P(f"w_mu{lo}", C2, C2, roff=l * C2),
                                  preferred_element_type=F32)
                lv = lv + jnp.dot(enc[l], P(f"w_lv{lo}", C2, C2, roff=l * C2),
                                  preferred_element_type=F32)
            lv = jnp.clip(lv, -30.0, 20.0)             # torch.clamp in the spec
            eps = data_ref[XROWS + lo * B:XROWS + (lo + 1) * B, 0:C2]
            z_blocks.append(mu + eps * jnp.exp(0.5 * lv))   # std = exp(.5*lv)
            out_ref[(1 + lo) * B:(2 + lo) * B, 0:C2] = mu
            out_ref[(1 + Lo + lo) * B:(2 + Lo + lo) * B, 0:C2] = lv

        # ------------- Decoder: ResidualLayer(C2, pool=1) ------------------
        # TODO(synk): residual_connection is not defined in the spec; assumed
        #             the standard skip x + f(x).
        h = bn(z_blocks, "r_g0", "r_b0", C2)
        f = conv_relu(h, "r_w", "r_cb", C2, C2)        # MaxPool1d(1) == identity
        (f,) = bn([f], "r_g1", "r_b1", C2)
        res = [z_blocks[lo] + f[lo * B:(lo + 1) * B, :] for lo in range(Lo)]

        # ------------- Decoder: SingleLayer(C2 -> C, pool=2) ---------------
        h = bn(res, "d_g0", "d_b0", C2)
        y = conv_relu(h, "d_w", "d_cb", C2, C)         # (Lo*B, C)
        dec = jnp.maximum(y[0:B, :], y[B:2 * B, :])    # pool 2 over Lo=2 -> len 1
        (dec,) = bn([dec], "d_g1", "d_b1", C)
        out_ref[0:B, 0:C] = dec

    return kernel


# ============================================================================
# Wrapper / parameter preprocessing (pure layout plumbing, done once).
# ============================================================================
def prepare_params(params, C, lambd, L):
    """Pack ALL parameters into one lane-padded (P, 128) f32 slab (1 DMA)."""
    C2, Lo = C * lambd, L // 2
    offs, total = _param_layout(C, C2, Lo)
    slab = jnp.zeros((total, 128), F32)

    def put(name, arr):
        nonlocal slab
        a = jnp.asarray(arr, F32)
        if a.ndim == 1:
            a = a.reshape(1, -1)
        slab = slab.at[offs[name]:offs[name] + a.shape[0], 0:a.shape[1]].set(a)

    def conv_taps(w):            # (Cout, Cin, 3) -> (3*Cin, Cout), tap-major rows
        w = jnp.asarray(w, F32)
        return jnp.concatenate([w[:, :, k].T for k in range(3)], axis=0)

    enc, res, dec = params["enc"], params["dec_res"], params["dec_single"]
    put("e_g0", enc["bn0_g"]); put("e_b0", enc["bn0_b"])
    put("e_w", conv_taps(enc["conv_w"])); put("e_cb", enc["conv_b"])
    put("e_g1", enc["bn1_g"]); put("e_b1", enc["bn1_b"])

    # fc_w: (2D, D), out index = m*D + c'*Lo + lo, in index = c*Lo + l.
    fcw = jnp.asarray(params["fc_w"], F32).reshape(2, C2, Lo, C2, Lo)
    fcb = jnp.asarray(params["fc_b"], F32).reshape(2, C2, Lo)
    for lo in range(Lo):
        put(f"w_mu{lo}", jnp.transpose(fcw[0, :, lo], (2, 1, 0)).reshape(Lo * C2, C2))
        put(f"w_lv{lo}", jnp.transpose(fcw[1, :, lo], (2, 1, 0)).reshape(Lo * C2, C2))
        put(f"b_mu{lo}", fcb[0, :, lo]); put(f"b_lv{lo}", fcb[1, :, lo])

    put("r_g0", res["bn0_g"]); put("r_b0", res["bn0_b"])
    put("r_w", conv_taps(res["conv_w"])); put("r_cb", res["conv_b"])
    put("r_g1", res["bn1_g"]); put("r_b1", res["bn1_b"])

    put("d_g0", dec["bn0_g"]); put("d_b0", dec["bn0_b"])
    put("d_w", conv_taps(dec["conv_w"])); put("d_cb", dec["conv_b"])
    put("d_g1", dec["bn1_g"]); put("d_b1", dec["bn1_b"])
    return slab


def make_vae_forward(B, C, lambd, L):
    C2, Lo = C * lambd, L // 2
    D = C2 * Lo
    offs, _ = _param_layout(C, C2, Lo)
    kernel = _build_kernel(B, C, C2, L, Lo, offs)
    XROWS = (L + Lo) * B                 # x rows + eps rows in the data slab
    OROWS = (1 + 2 * Lo) * B             # dec | mu blocks | logvar blocks
    vmem = pl.BlockSpec(memory_space=pltpu.MemorySpace.VMEM)
    pcall = pl.pallas_call(
        kernel,
        out_shape=jax.ShapeDtypeStruct((OROWS, 128), F32),
        in_specs=[vmem, vmem],
        out_specs=vmem,
        scratch_shapes=[pltpu.VMEM((L * B + 2 * B, C2), F32)],   # shared conv pad
    )

    @jax.jit
    def fwd(x_ncl, eps, pslab):
        # Boundary layout glue only: fold (position, batch) onto sublane rows
        # in l-major order and pack x / eps into one small data slab (1 DMA).
        x_lb = jnp.transpose(x_ncl.astype(F32), (2, 0, 1)).reshape(L * B, C)
        eps3 = eps.astype(F32).reshape(B, C2, Lo)
        data = jnp.zeros((XROWS, 128), F32)
        data = data.at[0:L * B, 0:C].set(x_lb)
        for lo in range(Lo):
            data = data.at[L * B + lo * B:L * B + (lo + 1) * B, 0:C2].set(eps3[:, :, lo])
        out = pcall(data, pslab)
        dec = out[0:B, 0:C].reshape(B, C, 1)                      # NCL, length 1
        mu = jnp.stack([out[(1 + lo) * B:(2 + lo) * B, 0:C2]
                        for lo in range(Lo)], axis=-1).reshape(B, D)
        lv = jnp.stack([out[(1 + Lo + lo) * B:(2 + Lo + lo) * B, 0:C2]
                        for lo in range(Lo)], axis=-1).reshape(B, D)
        return dec, mu, lv

    return fwd


# ----------------------------------------------------------------------------
# Pure-JAX reference (mirrors the PyTorch module op-for-op) for validation.
# ----------------------------------------------------------------------------
def _ref_forward(x_ncl, params, eps):
    HI = lax.Precision.HIGHEST

    def bn(x, g, b):                              # x: (B, C, L), training mode
        mean = jnp.mean(x, axis=(0, 2), keepdims=True)
        var = jnp.mean((x - mean) ** 2, axis=(0, 2), keepdims=True)
        return (x - mean) / jnp.sqrt(var + BN_EPS) * g[None, :, None] + b[None, :, None]

    def conv(x, w, bias):                         # Conv1d(k=3, s=1, p=1)
        L = x.shape[2]
        xp = jnp.pad(x, ((0, 0), (0, 0), (1, 1)))
        y = sum(jnp.einsum("oi,bil->bol", w[:, :, k], xp[:, :, k:k + L],
                           precision=HI) for k in range(3))
        return y + bias[None, :, None]

    def maxpool(x, p):
        if p == 1:
            return x
        B, C, L = x.shape
        return x[:, :, :(L // p) * p].reshape(B, C, L // p, p).max(axis=-1)

    def single(x, prm, pool):
        h = bn(x, prm["bn0_g"], prm["bn0_b"])
        h = jnp.maximum(conv(h, prm["conv_w"], prm["conv_b"]), 0.0)
        h = maxpool(h, pool)
        return bn(h, prm["bn1_g"], prm["bn1_b"])

    enc = single(x_ncl, params["enc"], 2)
    B, c, l = enc.shape
    out = jnp.einsum("bi,oi->bo", enc.reshape(B, c * l), params["fc_w"],
                     precision=HI) + params["fc_b"]
    mu, lv = out[:, :c * l], jnp.clip(out[:, c * l:], -30.0, 20.0)
    z = (mu + eps * jnp.sqrt(jnp.exp(lv))).reshape(B, c, l)
    r = z + single(z, params["dec_res"], 1)       # residual_connection
    dec = single(r, params["dec_single"], 2)
    return dec, mu, lv


# ----------------------------------------------------------------------------
# Deterministic parameter initialization
# ----------------------------------------------------------------------------
def init_params(key, channels, lambd):
    C, C2 = channels, channels * lambd
    out_ch = channels * lambd ** 2                # channels * lambd**len(arch)
    ks = iter(jax.random.split(key, 24))

    def nrm(shape, scale=0.1):
        return scale * jax.random.normal(next(ks), shape, F32)

    def bn_p(n):
        return 1.0 + nrm((n,)), nrm((n,))

    def layer(cin, cout):
        g0, b0 = bn_p(cin)
        g1, b1 = bn_p(cout)
        return {"bn0_g": g0, "bn0_b": b0,
                "conv_w": nrm((cout, cin, 3)), "conv_b": nrm((cout,)),
                "bn1_g": g1, "bn1_b": b1}

    return {
        "enc": layer(C, C2),
        "fc_w": nrm((2 * out_ch, out_ch)),
        "fc_b": nrm((2 * out_ch,)),
        "dec_res": layer(C2, C2),
        "dec_single": layer(C2, C),
    }


if __name__ == "__main__":
    B, C, lambd, L = 2, 8, 2, 4                  # batch=2, channels=8, input_size=4
    out_ch = C * lambd ** 2                      # fc in-features = 32

    key = jax.random.PRNGKey(0)
    k_x, k_eps, k_p = jax.random.split(key, 3)
    x = jax.random.normal(k_x, (B, C, L), F32)                   # NCL input
    eps = jax.random.normal(k_eps, (B, out_ch), F32)             # torch.randn_like
    params = init_params(k_p, C, lambd)
    pslab = prepare_params(params, C, lambd, L)

    vae_forward = make_vae_forward(B, C, lambd, L)
    decoded, mu, logvar = jax.block_until_ready(vae_forward(x, eps, pslab))

    assert decoded.shape == (B, C, 1)
    assert mu.shape == (B, out_ch) and logvar.shape == (B, out_ch)
    assert jnp.all(jnp.isfinite(decoded)) and jnp.all(jnp.isfinite(mu))

    d_r, mu_r, lv_r = _ref_forward(x, params, eps)
    assert jnp.allclose(decoded, d_r, rtol=5e-3, atol=5e-3)
    assert jnp.allclose(mu, mu_r, rtol=5e-3, atol=5e-3)
    assert jnp.allclose(logvar, lv_r, rtol=5e-3, atol=5e-3)

    print("KERNEL_OK")
</pallas_src>

<mosaic_0001>
module attributes {stable_mosaic.version = 11 : i64} {
  func.func @kernel(%arg0: memref<12x128xf32, #tpu.memory_space<vmem>>, %arg1: memref<267x128xf32, #tpu.memory_space<vmem>>, %arg2: memref<10x128xf32, #tpu.memory_space<vmem>>, %arg3: memref<12x16xf32, #tpu.memory_space<vmem>>) attributes {dimension_semantics = [], scalar_prefetch = 0 : i64, scratch_operands = 1 : i64, tpu.core_type = #tpu.core_type<tc>} {
    %cst = arith.constant 0.000000e+00 : f32
    %0 = vector.broadcast %cst : f32 to vector<10x128xf32>
    %c0 = arith.constant 0 : index
    %c0_0 = arith.constant 0 : index
    %1 = vector.load %arg2[%c0, %c0_0] : memref<10x128xf32, #tpu.memory_space<vmem>>, vector<10x128xf32>
    tpu.vector_store %arg2[%c0, %c0_0], %0 {strides = array<i32>} : memref<10x128xf32, #tpu.memory_space<vmem>>, vector<10x128xf32>,
    %c0_1 = arith.constant 0 : index
    %c0_2 = arith.constant 0 : index
    %2 = vector.load %arg0[%c0_1, %c0_2] : memref<12x128xf32, #tpu.memory_space<vmem>>, vector<8x8xf32>
    %c0_3 = arith.constant 0 : index
    %c0_4 = arith.constant 0 : index
    %3 = vector.load %arg1[%c0_3, %c0_4] : memref<267x128xf32, #tpu.memory_space<vmem>>, vector<1x8xf32>
    %c1 = arith.constant 1 : index
    %c0_5 = arith.constant 0 : index
    %4 = vector.load %arg1[%c1, %c0_5] : memref<267x128xf32, #tpu.memory_space<vmem>>, vector<1x8xf32>
    %cst_6 = arith.constant dense<0.000000e+00> : vector<8xf32>
    %5 = vector.multi_reduction <add>, %2, %cst_6 [0] : vector<8x8xf32> to vector<8xf32>
    %6 = vector.shape_cast %5 : vector<8xf32> to vector<1x8xf32>
    %cst_7 = arith.constant 0.000000e+00 : f32
    %7 = vector.broadcast %cst_7 : f32 to vector<1x8xf32>
    %8 = arith.addf %7, %6 : vector<1x8xf32>
    %9 = arith.mulf %2, %2 : vector<8x8xf32>
    %cst_8 = arith.constant dense<0.000000e+00> : vector<8xf32>
    %10 = vector.multi_reduction <add>, %9, %cst_8 [0] : vector<8x8xf32> to vector<8xf32>
    %11 = vector.shape_cast %10 : vector<8xf32> to vector<1x8xf32>
    %cst_9 = arith.constant 0.000000e+00 : f32
    %12 = vector.broadcast %cst_9 : f32 to vector<1x8xf32>
    %13 = arith.addf %12, %11 : vector<1x8xf32>
    %cst_10 = arith.constant 8.000000e+00 : f32
    %14 = vector.broadcast %cst_10 : f32 to vector<1x8xf32>
    %15 = arith.divf %8, %14 : vector<1x8xf32>
    %cst_11 = arith.constant 8.000000e+00 : f32
    %16 = vector.broadcast %cst_11 : f32 to vector<1x8xf32>
    %17 = arith.divf %13, %16 : vector<1x8xf32>
    %18 = arith.mulf %15, %15 : vector<1x8xf32>
    %19 = arith.subf %17, %18 : vector<1x8xf32>
    %cst_12 = arith.constant 0.000000e+00 : f32
    %20 = vector.broadcast %cst_12 : f32 to vector<1x8xf32>
    %21 = arith.maximumf %19, %20 : vector<1x8xf32>
    %cst_13 = arith.constant 9.99999974E-6 : f32
    %22 = vector.broadcast %cst_13 : f32 to vector<1x8xf32>
    %23 = arith.addf %21, %22 : vector<1x8xf32>
    %24 = math.rsqrt %23 : vector<1x8xf32>
    %25 = arith.mulf %24, %3 : vector<1x8xf32>
    %26 = arith.mulf %15, %25 : vector<1x8xf32>
    %27 = arith.subf %4, %26 : vector<1x8xf32>
    %28 = vector.broadcast %25 : vector<1x8xf32> to vector<8x8xf32>
    %29 = arith.mulf %2, %28 : vector<8x8xf32>
    %30 = vector.broadcast %27 : vector<1x8xf32> to vector<8x8xf32>
    %31 = arith.addf %29, %30 : vector<8x8xf32>
    %cst_14 = arith.constant 0.000000e+00 : f32
    %32 = vector.broadcast %cst_14 : f32 to vector<2x8xf32>
    %c0_15 = arith.constant 0 : index
    %c0_16 = arith.constant 0 : index
    %33 = vector.load %arg3[%c0_15, %c0_16] : memref<12x16xf32, #tpu.memory_space<vmem>>, vector<2x8xf32>
    tpu.vector_store %arg3[%c0_15, %c0_16], %32 {strides = array<i32>} : memref<12x16xf32, #tpu.memory_space<vmem>>, vector<2x8xf32>,
    %c10 = arith.constant 10 : index
    %c0_17 = arith.constant 0 : index
    %34 = vector.load %arg3[%c10, %c0_17] : memref<12x16xf32, #tpu.memory_space<vmem>>, vector<2x8xf32>
    tpu.vector_store %arg3[%c10, %c0_17], %32 {strides = array<i32>} : memref<12x16xf32, #tpu.memory_space<vmem>>, vector<2x8xf32>,
    %c2 = arith.constant 2 : index
    %c0_18 = arith.constant 0 : index
    %35 = vector.load %arg3[%c2, %c0_18] : memref<12x16xf32, #tpu.memory_space<vmem>>, vector<8x8xf32>
    tpu.vector_store %arg3[%c2, %c0_18], %31 {strides = array<i32>} : memref<12x16xf32, #tpu.memory_space<vmem>>, vector<8x8xf32>,
    %c26 = arith.constant 26 : index
    %c0_19 = arith.constant 0 : index
    %36 = vector.load %arg1[%c26, %c0_19] : memref<267x128xf32, #tpu.memory_space<vmem>>, vector<1x16xf32>
    %c0_20 = arith.constant 0 : index
    %c0_21 = arith.constant 0 : index
    %37 = vector.load %arg3[%c0_20, %c0_21] : memref<12x16xf32, #tpu.memory_space<vmem>>, vector<8x8xf32>
    %c2_22 = arith.constant 2 : index
    %c0_23 = arith.constant 0 : index
    %38 = vector.load %arg1[%c2_22, %c0_23] : memref<267x128xf32, #tpu.memory_space<vmem>>, vector<8x16xf32>
    %cst_24 = arith.constant dense<0.000000e+00> : vector<8x16xf32>
    %39 = tpu.matmul %37, %38, %cst_24 {dimension_numbers = #tpu.dot_dimension_numbers<[1], [0], [0], [1], [0, 0, 1, 1], [], []>} : vector<8x8xf32>, vector<8x16xf32>, vector<8x16xf32> -> vector<8x16xf32>
    %40 = vector.broadcast %36 : vector<1x16xf32> to vector<8x16xf32>
    %41 = arith.addf %40, %39 : vector<8x16xf32>
    %c2_25 = arith.constant 2 : index
    %c0_26 = arith.constant 0 : index
    %42 = vector.load %arg3[%c2_25, %c0_26] : memref<12x16xf32, #tpu.memory_space<vmem>>, vector<8x8xf32>
    %c10_27 = arith.constant 10 : index
    %c0_28 = arith.constant 0 : index
    %43 = vector.load %arg1[%c10_27, %c0_28] : memref<267x128xf32, #tpu.memory_space<vmem>>, vector<8x16xf32>
    %cst_29 = arith.constant dense<0.000000e+00> : vector<8x16xf32>
    %44 = tpu.matmul %42, %43, %cst_29 {dimension_numbers = #tpu.dot_dimension_numbers<[1], [0], [0], [1], [0, 0, 1, 1], [], []>} : vector<8x8xf32>, vector<8x16xf32>, vector<8x16xf32> -> vector<8x16xf32>
    %45 = arith.addf %41, %44 : vector<8x16xf32>
    %c4 = arith.constant 4 : index
    %c0_30 = arith.constant 0 : index
    %46 = vector.load %arg3[%c4, %c0_30] : memref<12x16xf32, #tpu.memory_space<vmem>>, vector<8x8xf32>
    %c18 = arith.constant 18 : index
    %c0_31 = arith.constant 0 : index
    %47 = vector.load %arg1[%c18, %c0_31] : memref<267x128xf32, #tpu.memory_space<vmem>>, vector<8x16xf32>
    %cst_32 = arith.constant dense<0.000000e+00> : vector<8x16xf32>
    %48 = tpu.matmul %46, %47, %cst_32 {dimension_numbers = #tpu.dot_dimension_numbers<[1], [0], [0], [1], [0, 0, 1, 1], [], []>} : vector<8x8xf32>, vector<8x16xf32>, vector<8x16xf32> -> vector<8x16xf32>
    %49 = arith.addf %45, %48 : vector<8x16xf32>
    %cst_33 = arith.constant 0.000000e+00 : f32
    %50 = vector.broadcast %cst_33 : f32 to vector<8x16xf32>
    %51 = arith.maximumf %49, %50 : vector<8x16xf32>
    %52 = vector.extract_strided_slice %51 {offsets = [0, 0], sizes = [2, 16], strides = [1, 1]} : vector<8x16xf32> to vector<2x16xf32>
    %53 = vector.extract_strided_slice %51 {offsets = [2, 0], sizes = [2, 16], strides = [1, 1]} : vector<8x16xf32> to vector<2x16xf32>
    %54 = arith.maximumf %52, %53 : vector<2x16xf32>
    %55 = vector.extract_strided_slice %51 {offsets = [4, 0], sizes = [2, 16], strides = [1, 1]} : vector<8x16xf32> to vector<2x16xf32>
    %56 = vector.extract_strided_slice %51 {offsets = [6, 0], sizes = [2, 16], strides = [1, 1]} : vector<8x16xf32> to vector<2x16xf32>
    %57 = arith.maximumf %55, %56 : vector<2x16xf32>
    %c27 = arith.constant 27 : index
    %c0_34 = arith.constant 0 : index
    %58 = vector.load %arg1[%c27, %c0_34] : memref<267x128xf32, #tpu.memory_space<vmem>>, vector<1x16xf32>
    %c28 = arith.constant 28 : index
    %c0_35 = arith.constant 0 : index
    %59 = vector.load %arg1[%c28, %c0_35] : memref<267x128xf32, #tpu.memory_space<vmem>>, vector<1x16xf32>
    %cst_36 = arith.constant dense<0.000000e+00> : vector<16xf32>
    %60 = vector.multi_reduction <add>, %54, %cst_36 [0] : vector<2x16xf32> to vector<16xf32>
    %61 = vector.shape_cast %60 : vector<16xf32> to vector<1x16xf32>
    %cst_37 = arith.constant 0.000000e+00 : f32
    %62 = vector.broadcast %cst_37 : f32 to vector<1x16xf32>
    %63 = arith.addf %62, %61 : vector<1x16xf32>
    %cst_38 = arith.constant dense<0.000000e+00> : vector<16xf32>
    %64 = vector.multi_reduction <add>, %57, %cst_38 [0] : vector<2x16xf32> to vector<16xf32>
    %65 = vector.shape_cast %64 : vector<16xf32> to vector<1x16xf32>
    %66 = arith.addf %63, %65 : vector<1x16xf32>
    %67 = arith.mulf %54, %54 : vector<2x16xf32>
    %cst_39 = arith.constant dense<0.000000e+00> : vector<16xf32>
    %68 = vector.multi_reduction <add>, %67, %cst_39 [0] : vector<2x16xf32> to vector<16xf32>
    %69 = vector.shape_cast %68 : vector<16xf32> to vector<1x16xf32>
    %cst_40 = arith.constant 0.000000e+00 : f32
    %70 = vector.broadcast %cst_40 : f32 to vector<1x16xf32>
    %71 = arith.addf %70, %69 : vector<1x16xf32>
    %72 = arith.mulf %57, %57 : vector<2x16xf32>
    %cst_41 = arith.constant dense<0.000000e+00> : vector<16xf32>
    %73 = vector.multi_reduction <add>, %72, %cst_41 [0] : vector<2x16xf32> to vector<16xf32>
    %74 = vector.shape_cast %73 : vector<16xf32> to vector<1x16xf32>
    %75 = arith.addf %71, %74 : vector<1x16xf32>
    %cst_42 = arith.constant 4.000000e+00 : f32
    %76 = vector.broadcast %cst_42 : f32 to vector<1x16xf32>
    %77 = arith.divf %66, %76 : vector<1x16xf32>
    %cst_43 = arith.constant 4.000000e+00 : f32
    %78 = vector.broadcast %cst_43 : f32 to vector<1x16xf32>
    %79 = arith.divf %75, %78 : vector<1x16xf32>
    %80 = arith.mulf %77, %77 : vector<1x16xf32>
    %81 = arith.subf %79, %80 : vector<1x16xf32>
    %cst_44 = arith.constant 0.000000e+00 : f32
    %82 = vector.broadcast %cst_44 : f32 to vector<1x16xf32>
    %83 = arith.maximumf %81, %82 : vector<1x16xf32>
    %cst_45 = arith.constant 9.99999974E-6 : f32
    %84 = vector.broadcast %cst_45 : f32 to vector<1x16xf32>
    %85 = arith.addf %83, %84 : vector<1x16xf32>
    %86 = math.rsqrt %85 : vector<1x16xf32>
    %87 = arith.mulf %86, %58 : vector<1x16xf32>
    %88 = arith.mulf %77, %87 : vector<1x16xf32>
    %89 = arith.subf %59, %88 : vector<1x16xf32>
    %90 = vector.broadcast %87 : vector<1x16xf32> to vector<2x16xf32>
    %91 = arith.mulf %54, %90 : vector<2x16xf32>
    %92 = vector.broadcast %89 : vector<1x16xf32> to vector<2x16xf32>
    %93 = arith.addf %91, %92 : vector<2x16xf32>
    %94 = vector.broadcast %87 : vector<1x16xf32> to vector<2x16xf32>
    %95 = arith.mulf %57, %94 : vector<2x16xf32>
    %96 = vector.broadcast %89 : vector<1x16xf32> to vector<2x16xf32>
    %97 = arith.addf %95, %96 : vector<2x16xf32>
    %c93 = arith.constant 93 : index
    %c0_46 = arith.constant 0 : index
    %98 = vector.load %arg1[%c93, %c0_46] : memref<267x128xf32, #tpu.memory_space<vmem>>, vector<1x16xf32>
    %c94 = arith.constant 94 : index
    %c0_47 = arith.constant 0 : index
    %99 = vector.load %arg1[%c94, %c0_47] : memref<267x128xf32, #tpu.memory_space<vmem>>, vector<1x16xf32>
    %c29 = arith.constant 29 : index
    %c0_48 = arith.constant 0 : index
    %100 = vector.load %arg1[%c29, %c0_48] : memref<267x128xf32, #tpu.memory_space<vmem>>, vector<16x16xf32>
    %cst_49 = arith.constant dense<0.000000e+00> : vector<2x16xf32>
    %101 = tpu.matmul %93, %100, %cst_49 {dimension_numbers = #tpu.dot_dimension_numbers<[1], [0], [0], [1], [0, 0, 1, 1], [], []>} : vector<2x16xf32>, vector<16x16xf32>, vector<2x16xf32> -> vector<2x16xf32>
    %102 = vector.broadcast %98 : vector<1x16xf32> to vector<2x16xf32>
    %103 = arith.addf %102, %101 : vector<2x16xf32>
    %c61 = arith.constant 61 : index
    %c0_50 = arith.constant 0 : index
    %104 = vector.load %arg1[%c61, %c0_50] : memref<267x128xf32, #tpu.memory_space<vmem>>, vector<16x16xf32>
    %cst_51 = arith.constant dense<0.000000e+00> : vector<2x16xf32>
    %105 = tpu.matmul %93, %104, %cst_51 {dimension_numbers = #tpu.dot_dimension_numbers<[1], [0], [0], [1], [0, 0, 1, 1], [], []>} : vector<2x16xf32>, vector<16x16xf32>, vector<2x16xf32> -> vector<2x16xf32>
    %106 = vector.broadcast %99 : vector<1x16xf32> to vector<2x16xf32>
    %107 = arith.addf %106, %105 : vector<2x16xf32>
    %c45 = arith.constant 45 : index
    %c0_52 = arith.constant 0 : index
    %108 = vector.load %arg1[%c45, %c0_52] : memref<267x128xf32, #tpu.memory_space<vmem>>, vector<16x16xf32>
    %cst_53 = arith.constant dense<0.000000e+00> : vector<2x16xf32>
    %109 = tpu.matmul %97, %108, %cst_53 {dimension_numbers = #tpu.dot_dimension_numbers<[1], [0], [0], [1], [0, 0, 1, 1], [], []>} : vector<2x16xf32>, vector<16x16xf32>, vector<2x16xf32> -> vector<2x16xf32>
    %110 = arith.addf %103, %109 : vector<2x16xf32>
    %c77 = arith.constant 77 : index
    %c0_54 = arith.constant 0 : index
    %111 = vector.load %arg1[%c77, %c0_54] : memref<267x128xf32, #tpu.memory_space<vmem>>, vector<16x16xf32>
    %cst_55 = arith.constant dense<0.000000e+00> : vector<2x16xf32>
    %112 = tpu.matmul %97, %111, %cst_55 {dimension_numbers = #tpu.dot_dimension_numbers<[1], [0], [0], [1], [0, 0, 1, 1], [], []>} : vector<2x16xf32>, vector<16x16xf32>, vector<2x16xf32> -> vector<2x16xf32>
    %113 = arith.addf %107, %112 : vector<2x16xf32>
    %cst_56 = arith.constant -3.000000e+01 : f32
    %cst_57 = arith.constant 2.000000e+01 : f32
    %114 = vector.broadcast %cst_56 : f32 to vector<2x16xf32>
    %115 = arith.maximumf %114, %113 : vector<2x16xf32>
    %116 = vector.broadcast %cst_57 : f32 to vector<2x16xf32>
    %117 = arith.minimumf %116, %115 : vector<2x16xf32>
    %c8 = arith.constant 8 : index
    %c0_58 = arith.constant 0 : index
    %118 = vector.load %arg0[%c8, %c0_58] : memref<12x128xf32, #tpu.memory_space<vmem>>, vector<2x16xf32>
    %cst_59 = arith.constant 5.000000e-01 : f32
    %119 = vector.broadcast %cst_59 : f32 to vector<2x16xf32>
    %120 = arith.mulf %119, %117 : vector<2x16xf32>
    %121 = math.exp %120 : vector<2x16xf32>
    %122 = arith.mulf %118, %121 : vector<2x16xf32>
    %123 = arith.addf %110, %122 : vector<2x16xf32>
    %c2_60 = arith.constant 2 : index
    %c0_61 = arith.constant 0 : index
    %124 = vector.load %arg2[%c2_60, %c0_61] : memref<10x128xf32, #tpu.memory_space<vmem>>, vector<2x16xf32>
    tpu.vector_store %arg2[%c2_60, %c0_61], %110 {strides = array<i32>} : memref<10x128xf32, #tpu.memory_space<vmem>>, vector<2x16xf32>,
    %c6 = arith.constant 6 : index
    %c0_62 = arith.constant 0 : index
    %125 = vector.load %arg2[%c6, %c0_62] : memref<10x128xf32, #tpu.memory_space<vmem>>, vector<2x16xf32>
    tpu.vector_store %arg2[%c6, %c0_62], %117 {strides = array<i32>} : memref<10x128xf32, #tpu.memory_space<vmem>>, vector<2x16xf32>,
    %c159 = arith.constant 159 : index
    %c0_63 = arith.constant 0 : index
    %126 = vector.load %arg1[%c159, %c0_63] : memref<267x128xf32, #tpu.memory_space<vmem>>, vector<1x16xf32>
    %c160 = arith.constant 160 : index
    %c0_64 = arith.constant 0 : index
    %127 = vector.load %arg1[%c160, %c0_64] : memref<267x128xf32, #tpu.memory_space<vmem>>, vector<1x16xf32>
    %c95 = arith.constant 95 : index
    %c0_65 = arith.constant 0 : index
    %128 = vector.load %arg1[%c95, %c0_65] : memref<267x128xf32, #tpu.memory_space<vmem>>, vector<16x16xf32>
    %cst_66 = arith.constant dense<0.000000e+00> : vector<2x16xf32>
    %129 = tpu.matmul %93, %128, %cst_66 {dimension_numbers = #tpu.dot_dimension_numbers<[1], [0], [0], [1], [0, 0, 1, 1], [], []>} : vector<2x16xf32>, vector<16x16xf32>, vector<2x16xf32> -> vector<2x16xf32>
    %130 = vector.broadcast %126 : vector<1x16xf32> to vector<2x16xf32>
    %131 = arith.addf %130, %129 : vector<2x16xf32>
    %c127 = arith.constant 127 : index
    %c0_67 = arith.constant 0 : index
    %132 = vector.load %arg1[%c127, %c0_67] : memref<267x128xf32, #tpu.memory_space<vmem>>, vector<16x16xf32>
    %cst_68 = arith.constant dense<0.000000e+00> : vector<2x16xf32>
    %133 = tpu.matmul %93, %132, %cst_68 {dimension_numbers = #tpu.dot_dimension_numbers<[1], [0], [0], [1], [0, 0, 1, 1], [], []>} : vector<2x16xf32>, vector<16x16xf32>, vector<2x16xf32> -> vector<2x16xf32>
    %134 = vector.broadcast %127 : vector<1x16xf32> to vector<2x16xf32>
    %135 = arith.addf %134, %133 : vector<2x16xf32>
    %c111 = arith.constant 111 : index
    %c0_69 = arith.constant 0 : index
    %136 = vector.load %arg1[%c111, %c0_69] : memref<267x128xf32, #tpu.memory_space<vmem>>, vector<16x16xf32>
    %cst_70 = arith.constant dense<0.000000e+00> : vector<2x16xf32>
    %137 = tpu.matmul %97, %136, %cst_70 {dimension_numbers = #tpu.dot_dimension_numbers<[1], [0], [0], [1], [0, 0, 1, 1], [], []>} : vector<2x16xf32>, vector<16x16xf32>, vector<2x16xf32> -> vector<2x16xf32>
    %138 = arith.addf %131, %137 : vector<2x16xf32>
    %c143 = arith.constant 143 : index
    %c0_71 = arith.constant 0 : index
    %139 = vector.load %arg1[%c143, %c0_71] : memref<267x128xf32, #tpu.memory_space<vmem>>, vector<16x16xf32>
    %cst_72 = arith.constant dense<0.000000e+00> : vector<2x16xf32>
    %140 = tpu.matmul %97, %139, %cst_72 {dimension_numbers = #tpu.dot_dimension_numbers<[1], [0], [0], [1], [0, 0, 1, 1], [], []>} : vector<2x16xf32>, vector<16x16xf32>, vector<2x16xf32> -> vector<2x16xf32>
    %141 = arith.addf %135, %140 : vector<2x16xf32>
    %cst_73 = arith.constant -3.000000e+01 : f32
    %cst_74 = arith.constant 2.000000e+01 : f32
    %142 = vector.broadcast %cst_73 : f32 to vector<2x16xf32>
    %143 = arith.maximumf %142, %141 : vector<2x16xf32>
    %144 = vector.broadcast %cst_74 : f32 to vector<2x16xf32>
    %145 = arith.minimumf %144, %143 : vector<2x16xf32>
    %c10_75 = arith.constant 10 : index
    %c0_76 = arith.constant 0 : index
    %146 = vector.load %arg0[%c10_75, %c0_76] : memref<12x128xf32, #tpu.memory_space<vmem>>, vector<2x16xf32>
    %cst_77 = arith.constant 5.000000e-01 : f32
    %147 = vector.broadcast %cst_77 : f32 to vector<2x16xf32>
    %148 = arith.mulf %147, %145 : vector<2x16xf32>
    %149 = math.exp %148 : vector<2x16xf32>
    %150 = arith.mulf %146, %149 : vector<2x16xf32>
    %151 = arith.addf %138, %150 : vector<2x16xf32>
    %c4_78 = arith.constant 4 : index
    %c0_79 = arith.constant 0 : index
    %152 = vector.load %arg2[%c4_78, %c0_79] : memref<10x128xf32, #tpu.memory_space<vmem>>, vector<2x16xf32>
    tpu.vector_store %arg2[%c4_78, %c0_79], %138 {strides = array<i32>} : memref<10x128xf32, #tpu.memory_space<vmem>>, vector<2x16xf32>,
    %c8_80 = arith.constant 8 : index
    %c0_81 = arith.constant 0 : index
    %153 = vector.load %arg2[%c8_80, %c0_81] : memref<10x128xf32, #tpu.memory_space<vmem>>, vector<2x16xf32>
    tpu.vector_store %arg2[%c8_80, %c0_81], %145 {strides = array<i32>} : memref<10x128xf32, #tpu.memory_space<vmem>>, vector<2x16xf32>,
    %c161 = arith.constant 161 : index
    %c0_82 = arith.constant 0 : index
    %154 = vector.load %arg1[%c161, %c0_82] : memref<267x128xf32, #tpu.memory_space<vmem>>, vector<1x16xf32>
    %c162 = arith.constant 162 : index
    %c0_83 = arith.constant 0 : index
    %155 = vector.load %arg1[%c162, %c0_83] : memref<267x128xf32, #tpu.memory_space<vmem>>, vector<1x16xf32>
    %cst_84 = arith.constant dense<0.000000e+00> : vector<16xf32>
    %156 = vector.multi_reduction <add>, %123, %cst_84 [0] : vector<2x16xf32> to vector<16xf32>
    %157 = vector.shape_cast %156 : vector<16xf32> to vector<1x16xf32>
    %cst_85 = arith.constant 0.000000e+00 : f32
    %158 = vector.broadcast %cst_85 : f32 to vector<1x16xf32>
    %159 = arith.addf %158, %157 : vector<1x16xf32>
    %cst_86 = arith.constant dense<0.000000e+00> : vector<16xf32>
    %160 = vector.multi_reduction <add>, %151, %cst_86 [0] : vector<2x16xf32> to vector<16xf32>
    %161 = vector.shape_cast %160 : vector<16xf32> to vector<1x16xf32>
    %162 = arith.addf %159, %161 : vector<1x16xf32>
    %163 = arith.mulf %123, %123 : vector<2x16xf32>
    %cst_87 = arith.constant dense<0.000000e+00> : vector<16xf32>
    %164 = vector.multi_reduction <add>, %163, %cst_87 [0] : vector<2x16xf32> to vector<16xf32>
    %165 = vector.shape_cast %164 : vector<16xf32> to vector<1x16xf32>
    %cst_88 = arith.constant 0.000000e+00 : f32
    %166 = vector.broadcast %cst_88 : f32 to vector<1x16xf32>
    %167 = arith.addf %166, %165 : vector<1x16xf32>
    %168 = arith.mulf %151, %151 : vector<2x16xf32>
    %cst_89 = arith.constant dense<0.000000e+00> : vector<16xf32>
    %169 = vector.multi_reduction <add>, %168, %cst_89 [0] : vector<2x16xf32> to vector<16xf32>
    %170 = vector.shape_cast %169 : vector<16xf32> to vector<1x16xf32>
    %171 = arith.addf %167, %170 : vector<1x16xf32>
    %cst_90 = arith.constant 4.000000e+00 : f32
    %172 = vector.broadcast %cst_90 : f32 to vector<1x16xf32>
    %173 = arith.divf %162, %172 : vector<1x16xf32>
    %cst_91 = arith.constant 4.000000e+00 : f32
    %174 = vector.broadcast %cst_91 : f32 to vector<1x16xf32>
    %175 = arith.divf %171, %174 : vector<1x16xf32>
    %176 = arith.mulf %173, %173 : vector<1x16xf32>
    %177 = arith.subf %175, %176 : vector<1x16xf32>
    %cst_92 = arith.constant 0.000000e+00 : f32
    %178 = vector.broadcast %cst_92 : f32 to vector<1x16xf32>
    %179 = arith.maximumf %177, %178 : vector<1x16xf32>
    %cst_93 = arith.constant 9.99999974E-6 : f32
    %180 = vector.broadcast %cst_93 : f32 to vector<1x16xf32>
    %181 = arith.addf %179, %180 : vector<1x16xf32>
    %182 = math.rsqrt %181 : vector<1x16xf32>
    %183 = arith.mulf %182, %154 : vector<1x16xf32>
    %184 = arith.mulf %173, %183 : vector<1x16xf32>
    %185 = arith.subf %155, %184 : vector<1x16xf32>
    %186 = vector.broadcast %183 : vector<1x16xf32> to vector<2x16xf32>
    %187 = arith.mulf %123, %186 : vector<2x16xf32>
    %188 = vector.broadcast %185 : vector<1x16xf32> to vector<2x16xf32>
    %189 = arith.addf %187, %188 : vector<2x16xf32>
    %190 = vector.broadcast %183 : vector<1x16xf32> to vector<2x16xf32>
    %191 = arith.mulf %151, %190 : vector<2x16xf32>
    %192 = vector.broadcast %185 : vector<1x16xf32> to vector<2x16xf32>
    %193 = arith.addf %191, %192 : vector<2x16xf32>
    %cst_94 = arith.constant 0.000000e+00 : f32
    %194 = vector.broadcast %cst_94 : f32 to vector<2x16xf32>
    %c0_95 = arith.constant 0 : index
    %c0_96 = arith.constant 0 : index
    %195 = vector.load %arg3[%c0_95, %c0_96] : memref<12x16xf32, #tpu.memory_space<vmem>>, vector<2x16xf32>
    tpu.vector_store %arg3[%c0_95, %c0_96], %194 {strides = array<i32>} : memref<12x16xf32, #tpu.memory_space<vmem>>, vector<2x16xf32>,
    %c6_97 = arith.constant 6 : index
    %c0_98 = arith.constant 0 : index
    %196 = vector.load %arg3[%c6_97, %c0_98] : memref<12x16xf32, #tpu.memory_space<vmem>>, vector<2x16xf32>
    tpu.vector_store %arg3[%c6_97, %c0_98], %194 {strides = array<i32>} : memref<12x16xf32, #tpu.memory_space<vmem>>, vector<2x16xf32>,
    %c2_99 = arith.constant 2 : index
    %c0_100 = arith.constant 0 : index
    %197 = vector.load %arg3[%c2_99, %c0_100] : memref<12x16xf32, #tpu.memory_space<vmem>>, vector<2x16xf32>
    tpu.vector_store %arg3[%c2_99, %c0_100], %189 {strides = array<i32>} : memref<12x16xf32, #tpu.memory_space<vmem>>, vector<2x16xf32>,
    %c4_101 = arith.constant 4 : index
    %c0_102 = arith.constant 0 : index
    %198 = vector.load %arg3[%c4_101, %c0_102] : memref<12x16xf32, #tpu.memory_space<vmem>>, vector<2x16xf32>
    tpu.vector_store %arg3[%c4_101, %c0_102], %193 {strides = array<i32>} : memref<12x16xf32, #tpu.memory_space<vmem>>, vector<2x16xf32>,
    %c211 = arith.constant 211 : index
    %c0_103 = arith.constant 0 : index
    %199 = vector.load %arg1[%c211, %c0_103] : memref<267x128xf32, #tpu.memory_space<vmem>>, vector<1x16xf32>
    %c0_104 = arith.constant 0 : index
    %c0_105 = arith.constant 0 : index
    %200 = vector.load %arg3[%c0_104, %c0_105] : memref<12x16xf32, #tpu.memory_space<vmem>>, vector<4x16xf32>
    %c163 = arith.constant 163 : index
    %c0_106 = arith.constant 0 : index
    %201 = vector.load %arg1[%c163, %c0_106] : memref<267x128xf32, #tpu.memory_space<vmem>>, vector<16x16xf32>
    %cst_107 = arith.constant dense<0.000000e+00> : vector<4x16xf32>
    %202 = tpu.matmul %200, %201, %cst_107 {dimension_numbers = #tpu.dot_dimension_numbers<[1], [0], [0], [1], [0, 0, 1, 1], [], []>} : vector<4x16xf32>, vector<16x16xf32>, vector<4x16xf32> -> vector<4x16xf32>
    %203 = vector.broadcast %199 : vector<1x16xf32> to vector<4x16xf32>
    %204 = arith.addf %203, %202 : vector<4x16xf32>
    %c2_108 = arith.constant 2 : index
    %c0_109 = arith.constant 0 : index
    %205 = vector.load %arg3[%c2_108, %c0_109] : memref<12x16xf32, #tpu.memory_space<vmem>>, vector<4x16xf32>
    %c179 = arith.constant 179 : index
    %c0_110 = arith.constant 0 : index
    %206 = vector.load %arg1[%c179, %c0_110] : memref<267x128xf32, #tpu.memory_space<vmem>>, vector<16x16xf32>
    %cst_111 = arith.constant dense<0.000000e+00> : vector<4x16xf32>
    %207 = tpu.matmul %205, %206, %cst_111 {dimension_numbers = #tpu.dot_dimension_numbers<[1], [0], [0], [1], [0, 0, 1, 1], [], []>} : vector<4x16xf32>, vector<16x16xf32>, vector<4x16xf32> -> vector<4x16xf32>
    %208 = arith.addf %204, %207 : vector<4x16xf32>
    %c4_112 = arith.constant 4 : index
    %c0_113 = arith.constant 0 : index
    %209 = vector.load %arg3[%c4_112, %c0_113] : memref<12x16xf32, #tpu.memory_space<vmem>>, vector<4x16xf32>
    %c195 = arith.constant 195 : index
    %c0_114 = arith.constant 0 : index
    %210 = vector.load %arg1[%c195, %c0_114] : memref<267x128xf32, #tpu.memory_space<vmem>>, vector<16x16xf32>
    %cst_115 = arith.constant dense<0.000000e+00> : vector<4x16xf32>
    %211 = tpu.matmul %209, %210, %cst_115 {dimension_numbers = #tpu.dot_dimension_numbers<[1], [0], [0], [1], [0, 0, 1, 1], [], []>} : vector<4x16xf32>, vector<16x16xf32>, vector<4x16xf32> -> vector<4x16xf32>
    %212 = arith.addf %208, %211 : vector<4x16xf32>
    %cst_116 = arith.constant 0.000000e+00 : f32
    %213 = vector.broadcast %cst_116 : f32 to vector<4x16xf32>
    %214 = arith.maximumf %212, %213 : vector<4x16xf32>
    %c212 = arith.constant 212 : index
    %c0_117 = arith.constant 0 : index
    %215 = vector.load %arg1[%c212, %c0_117] : memref<267x128xf32, #tpu.memory_space<vmem>>, vector<1x16xf32>
    %c213 = arith.constant 213 : index
    %c0_118 = arith.constant 0 : index
    %216 = vector.load %arg1[%c213, %c0_118] : memref<267x128xf32, #tpu.memory_space<vmem>>, vector<1x16xf32>
    %cst_119 = arith.constant dense<0.000000e+00> : vector<16xf32>
    %217 = vector.multi_reduction <add>, %214, %cst_119 [0] : vector<4x16xf32> to vector<16xf32>
    %218 = vector.shape_cast %217 : vector<16xf32> to vector<1x16xf32>
    %cst_120 = arith.constant 0.000000e+00 : f32
    %219 = vector.broadcast %cst_120 : f32 to vector<1x16xf32>
    %220 = arith.addf %219, %218 : vector<1x16xf32>
    %221 = arith.mulf %214, %214 : vector<4x16xf32>
    %cst_121 = arith.constant dense<0.000000e+00> : vector<16xf32>
    %222 = vector.multi_reduction <add>, %221, %cst_121 [0] : vector<4x16xf32> to vector<16xf32>
    %223 = vector.shape_cast %222 : vector<16xf32> to vector<1x16xf32>
    %cst_122 = arith.constant 0.000000e+00 : f32
    %224 = vector.broadcast %cst_122 : f32 to vector<1x16xf32>
    %225 = arith.addf %224, %223 : vector<1x16xf32>
    %cst_123 = arith.constant 4.000000e+00 : f32
    %226 = vector.broadcast %cst_123 : f32 to vector<1x16xf32>
    %227 = arith.divf %220, %226 : vector<1x16xf32>
    %cst_124 = arith.constant 4.000000e+00 : f32
    %228 = vector.broadcast %cst_124 : f32 to vector<1x16xf32>
    %229 = arith.divf %225, %228 : vector<1x16xf32>
    %230 = arith.mulf %227, %227 : vector<1x16xf32>
    %231 = arith.subf %229, %230 : vector<1x16xf32>
    %cst_125 = arith.constant 0.000000e+00 : f32
    %232 = vector.broadcast %cst_125 : f32 to vector<1x16xf32>
    %233 = arith.maximumf %231, %232 : vector<1x16xf32>
    %cst_126 = arith.constant 9.99999974E-6 : f32
    %234 = vector.broadcast %cst_126 : f32 to vector<1x16xf32>
    %235 = arith.addf %233, %234 : vector<1x16xf32>
    %236 = math.rsqrt %235 : vector<1x16xf32>
    %237 = arith.mulf %236, %215 : vector<1x16xf32>
    %238 = arith.mulf %227, %237 : vector<1x16xf32>
    %239 = arith.subf %216, %238 : vector<1x16xf32>
    %240 = vector.broadcast %237 : vector<1x16xf32> to vector<4x16xf32>
    %241 = arith.mulf %214, %240 : vector<4x16xf32>
    %242 = vector.broadcast %239 : vector<1x16xf32> to vector<4x16xf32>
    %243 = arith.addf %241, %242 : vector<4x16xf32>
    %244 = vector.extract_strided_slice %243 {offsets = [0, 0], sizes = [2, 16], strides = [1, 1]} : vector<4x16xf32> to vector<2x16xf32>
    %245 = arith.addf %123, %244 : vector<2x16xf32>
    %246 = vector.extract_strided_slice %243 {offsets = [2, 0], sizes = [2, 16], strides = [1, 1]} : vector<4x16xf32> to vector<2x16xf32>
    %247 = arith.addf %151, %246 : vector<2x16xf32>
    %c214 = arith.constant 214 : index
    %c0_127 = arith.constant 0 : index
    %248 = vector.load %arg1[%c214, %c0_127] : memref<267x128xf32, #tpu.memory_space<vmem>>, vector<1x16xf32>
    %c215 = arith.constant 215 : index
    %c0_128 = arith.constant 0 : index
    %249 = vector.load %arg1[%c215, %c0_128] : memref<267x128xf32, #tpu.memory_space<vmem>>, vector<1x16xf32>
    %cst_129 = arith.constant dense<0.000000e+00> : vector<16xf32>
    %250 = vector.multi_reduction <add>, %245, %cst_129 [0] : vector<2x16xf32> to vector<16xf32>
    %251 = vector.shape_cast %250 : vector<16xf32> to vector<1x16xf32>
    %cst_130 = arith.constant 0.000000e+00 : f32
    %252 = vector.broadcast %cst_130 : f32 to vector<1x16xf32>
    %253 = arith.addf %252, %251 : vector<1x16xf32>
    %cst_131 = arith.constant dense<0.000000e+00> : vector<16xf32>
    %254 = vector.multi_reduction <add>, %247, %cst_131 [0] : vector<2x16xf32> to vector<16xf32>
    %255 = vector.shape_cast %254 : vector<16xf32> to vector<1x16xf32>
    %256 = arith.addf %253, %255 : vector<1x16xf32>
    %257 = arith.mulf %245, %245 : vector<2x16xf32>
    %cst_132 = arith.constant dense<0.000000e+00> : vector<16xf32>
    %258 = vector.multi_reduction <add>, %257, %cst_132 [0] : vector<2x16xf32> to vector<16xf32>
    %259 = vector.shape_cast %258 : vector<16xf32> to vector<1x16xf32>
    %cst_133 = arith.constant 0.000000e+00 : f32
    %260 = vector.broadcast %cst_133 : f32 to vector<1x16xf32>
    %261 = arith.addf %260, %259 : vector<1x16xf32>
    %262 = arith.mulf %247, %247 : vector<2x16xf32>
    %cst_134 = arith.constant dense<0.000000e+00> : vector<16xf32>
    %263 = vector.multi_reduction <add>, %262, %cst_134 [0] : vector<2x16xf32> to vector<16xf32>
    %264 = vector.shape_cast %263 : vector<16xf32> to vector<1x16xf32>
    %265 = arith.addf %261, %264 : vector<1x16xf32>
    %cst_135 = arith.constant 4.000000e+00 : f32
    %266 = vector.broadcast %cst_135 : f32 to vector<1x16xf32>
    %267 = arith.divf %256, %266 : vector<1x16xf32>
    %cst_136 = arith.constant 4.000000e+00 : f32
    %268 = vector.broadcast %cst_136 : f32 to vector<1x16xf32>
    %269 = arith.divf %265, %268 : vector<1x16xf32>
    %270 = arith.mulf %267, %267 : vector<1x16xf32>
    %271 = arith.subf %269, %270 : vector<1x16xf32>
    %cst_137 = arith.constant 0.000000e+00 : f32
    %272 = vector.broadcast %cst_137 : f32 to vector<1x16xf32>
    %273 = arith.maximumf %271, %272 : vector<1x16xf32>
    %cst_138 = arith.constant 9.99999974E-6 : f32
    %274 = vector.broadcast %cst_138 : f32 to vector<1x16xf32>
    %275 = arith.addf %273, %274 : vector<1x16xf32>
    %276 = math.rsqrt %275 : vector<1x16xf32>
    %277 = arith.mulf %276, %248 : vector<1x16xf32>
    %278 = arith.mulf %267, %277 : vector<1x16xf32>
    %279 = arith.subf %249, %278 : vector<1x16xf32>
    %280 = vector.broadcast %277 : vector<1x16xf32> to vector<2x16xf32>
    %281 = arith.mulf %245, %280 : vector<2x16xf32>
    %282 = vector.broadcast %279 : vector<1x16xf32> to vector<2x16xf32>
    %283 = arith.addf %281, %282 : vector<2x16xf32>
    %284 = vector.broadcast %277 : vector<1x16xf32> to vector<2x16xf32>
    %285 = arith.mulf %247, %284 : vector<2x16xf32>
    %286 = vector.broadcast %279 : vector<1x16xf32> to vector<2x16xf32>
    %287 = arith.addf %285, %286 : vector<2x16xf32>
    %cst_139 = arith.constant 0.000000e+00 : f32
    %288 = vector.broadcast %cst_139 : f32 to vector<2x16xf32>
    %c0_140 = arith.constant 0 : index
    %c0_141 = arith.constant 0 : index
    %289 = vector.load %arg3[%c0_140, %c0_141] : memref<12x16xf32, #tpu.memory_space<vmem>>, vector<2x16xf32>
    tpu.vector_store %arg3[%c0_140, %c0_141], %288 {strides = array<i32>} : memref<12x16xf32, #tpu.memory_space<vmem>>, vector<2x16xf32>,
    %c6_142 = arith.constant 6 : index
    %c0_143 = arith.constant 0 : index
    %290 = vector.load %arg3[%c6_142, %c0_143] : memref<12x16xf32, #tpu.memory_space<vmem>>, vector<2x16xf32>
    tpu.vector_store %arg3[%c6_142, %c0_143], %288 {strides = array<i32>} : memref<12x16xf32, #tpu.memory_space<vmem>>, vector<2x16xf32>,
    %c2_144 = arith.constant 2 : index
    %c0_145 = arith.constant 0 : index
    %291 = vector.load %arg3[%c2_144, %c0_145] : memref<12x16xf32, #tpu.memory_space<vmem>>, vector<2x16xf32>
    tpu.vector_store %arg3[%c2_144, %c0_145], %283 {strides = array<i32>} : memref<12x16xf32, #tpu.memory_space<vmem>>, vector<2x16xf32>,
    %c4_146 = arith.constant 4 : index
    %c0_147 = arith.constant 0 : index
    %292 = vector.load %arg3[%c4_146, %c0_147] : memref<12x16xf32, #tpu.memory_space<vmem>>, vector<2x16xf32>
    tpu.vector_store %arg3[%c4_146, %c0_147], %287 {strides = array<i32>} : memref<12x16xf32, #tpu.memory_space<vmem>>, vector<2x16xf32>,
    %c264 = arith.constant 264 : index
    %c0_148 = arith.constant 0 : index
    %293 = vector.load %arg1[%c264, %c0_148] : memref<267x128xf32, #tpu.memory_space<vmem>>, vector<1x8xf32>
    %c0_149 = arith.constant 0 : index
    %c0_150 = arith.constant 0 : index
    %294 = vector.load %arg3[%c0_149, %c0_150] : memref<12x16xf32, #tpu.memory_space<vmem>>, vector<4x16xf32>
    %c216 = arith.constant 216 : index
    %c0_151 = arith.constant 0 : index
    %295 = vector.load %arg1[%c216, %c0_151] : memref<267x128xf32, #tpu.memory_space<vmem>>, vector<16x8xf32>
    %cst_152 = arith.constant dense<0.000000e+00> : vector<4x8xf32>
    %296 = tpu.matmul %294, %295, %cst_152 {dimension_numbers = #tpu.dot_dimension_numbers<[1], [0], [0], [1], [0, 0, 1, 1], [], []>} : vector<4x16xf32>, vector<16x8xf32>, vector<4x8xf32> -> vector<4x8xf32>
    %297 = vector.broadcast %293 : vector<1x8xf32> to vector<4x8xf32>
    %298 = arith.addf %297, %296 : vector<4x8xf32>
    %c2_153 = arith.constant 2 : index
    %c0_154 = arith.constant 0 : index
    %299 = vector.load %arg3[%c2_153, %c0_154] : memref<12x16xf32, #tpu.memory_space<vmem>>, vector<4x16xf32>
    %c232 = arith.constant 232 : index
    %c0_155 = arith.constant 0 : index
    %300 = vector.load %arg1[%c232, %c0_155] : memref<267x128xf32, #tpu.memory_space<vmem>>, vector<16x8xf32>
    %cst_156 = arith.constant dense<0.000000e+00> : vector<4x8xf32>
    %301 = tpu.matmul %299, %300, %cst_156 {dimension_numbers = #tpu.dot_dimension_numbers<[1], [0], [0], [1], [0, 0, 1, 1], [], []>} : vector<4x16xf32>, vector<16x8xf32>, vector<4x8xf32> -> vector<4x8xf32>
    %302 = arith.addf %298, %301 : vector<4x8xf32>
    %c4_157 = arith.constant 4 : index
    %c0_158 = arith.constant 0 : index
    %303 = vector.load %arg3[%c4_157, %c0_158] : memref<12x16xf32, #tpu.memory_space<vmem>>, vector<4x16xf32>
    %c248 = arith.constant 248 : index
    %c0_159 = arith.constant 0 : index
    %304 = vector.load %arg1[%c248, %c0_159] : memref<267x128xf32, #tpu.memory_space<vmem>>, vector<16x8xf32>
    %cst_160 = arith.constant dense<0.000000e+00> : vector<4x8xf32>
    %305 = tpu.matmul %303, %304, %cst_160 {dimension_numbers = #tpu.dot_dimension_numbers<[1], [0], [0], [1], [0, 0, 1, 1], [], []>} : vector<4x16xf32>, vector<16x8xf32>, vector<4x8xf32> -> vector<4x8xf32>
    %306 = arith.addf %302, %305 : vector<4x8xf32>
    %cst_161 = arith.constant 0.000000e+00 : f32
    %307 = vector.broadcast %cst_161 : f32 to vector<4x8xf32>
    %308 = arith.maximumf %306, %307 : vector<4x8xf32>
    %309 = vector.extract_strided_slice %308 {offsets = [0, 0], sizes = [2, 8], strides = [1, 1]} : vector<4x8xf32> to vector<2x8xf32>
    %310 = vector.extract_strided_slice %308 {offsets = [2, 0], sizes = [2, 8], strides = [1, 1]} : vector<4x8xf32> to vector<2x8xf32>
    %311 = arith.maximumf %309, %310 : vector<2x8xf32>
    %c265 = arith.constant 265 : index
    %c0_162 = arith.constant 0 : index
    %312 = vector.load %arg1[%c265, %c0_162] : memref<267x128xf32, #tpu.memory_space<vmem>>, vector<1x8xf32>
    %c266 = arith.constant 266 : index
    %c0_163 = arith.constant 0 : index
    %313 = vector.load %arg1[%c266, %c0_163] : memref<267x128xf32, #tpu.memory_space<vmem>>, vector<1x8xf32>
    %cst_164 = arith.constant dense<0.000000e+00> : vector<8xf32>
    %314 = vector.multi_reduction <add>, %311, %cst_164 [0] : vector<2x8xf32> to vector<8xf32>
    %315 = vector.shape_cast %314 : vector<8xf32> to vector<1x8xf32>
    %cst_165 = arith.constant 0.000000e+00 : f32
    %316 = vector.broadcast %cst_165 : f32 to vector<1x8xf32>
    %317 = arith.addf %316, %315 : vector<1x8xf32>
    %318 = arith.mulf %311, %311 : vector<2x8xf32>
    %cst_166 = arith.constant dense<0.000000e+00> : vector<8xf32>
    %319 = vector.multi_reduction <add>, %318, %cst_166 [0] : vector<2x8xf32> to vector<8xf32>
    %320 = vector.shape_cast %319 : vector<8xf32> to vector<1x8xf32>
    %cst_167 = arith.constant 0.000000e+00 : f32
    %321 = vector.broadcast %cst_167 : f32 to vector<1x8xf32>
    %322 = arith.addf %321, %320 : vector<1x8xf32>
    %cst_168 = arith.constant 2.000000e+00 : f32
    %323 = vector.broadcast %cst_168 : f32 to vector<1x8xf32>
    %324 = arith.divf %317, %323 : vector<1x8xf32>
    %cst_169 = arith.constant 2.000000e+00 : f32
    %325 = vector.broadcast %cst_169 : f32 to vector<1x8xf32>
    %326 = arith.divf %322, %325 : vector<1x8xf32>
    %327 = arith.mulf %324, %324 : vector<1x8xf32>
    %328 = arith.subf %326, %327 : vector<1x8xf32>
    %cst_170 = arith.constant 0.000000e+00 : f32
    %329 = vector.broadcast %cst_170 : f32 to vector<1x8xf32>
    %330 = arith.maximumf %328, %329 : vector<1x8xf32>
    %cst_171 = arith.constant 9.99999974E-6 : f32
    %331 = vector.broadcast %cst_171 : f32 to vector<1x8xf32>
    %332 = arith.addf %330, %331 : vector<1x8xf32>
    %333 = math.rsqrt %332 : vector<1x8xf32>
    %334 = arith.mulf %333, %312 : vector<1x8xf32>
    %335 = arith.mulf %324, %334 : vector<1x8xf32>
    %336 = arith.subf %313, %335 : vector<1x8xf32>
    %337 = vector.broadcast %334 : vector<1x8xf32> to vector<2x8xf32>
    %338 = arith.mulf %311, %337 : vector<2x8xf32>
    %339 = vector.broadcast %336 : vector<1x8xf32> to vector<2x8xf32>
    %340 = arith.addf %338, %339 : vector<2x8xf32>
    %c0_172 = arith.constant 0 : index
    %c0_173 = arith.constant 0 : index
    %341 = vector.load %arg2[%c0_172, %c0_173] : memref<10x128xf32, #tpu.memory_space<vmem>>, vector<2x8xf32>
    tpu.vector_store %arg2[%c0_172, %c0_173], %340 {strides = array<i32>} : memref<10x128xf32, #tpu.memory_space<vmem>>, vector<2x8xf32>,
    return
  }
}

</mosaic_0001>

<bundles_post_ra>
// kernel: fwd.1
= control target key start
LH: loop header
LB: loop body
LE: loop exit
PB: predicated region body
PF: predicated region fallthrough
CT: control target
= control target key end

     0   :  { %7 = vsyncpa [#allocation4], 0  ;;  %s1926_s9 = smov [#allocation3]   ;;  %s2129_s0 = inlined_call_operand.vmem [shape: f32[12,128], index: 0, kind: input, shape index: {}]   ;;  %s2130_s1 = inlined_call_operand.hbm [shape: f32[267,128], index: 1, kind: input, shape index: {}]   ;;  %s2131_s2 = inlined_call_operand.vmem [shape: f32[10,128], index: 2, kind: output, shape index: {}]  }
   0x1   :  { %s15_s10 = sshll.u32 %s1926_s9, 4  ;;  %s16_s10 = int_to_ptr.vmem [resolvable:$true] %s15_s10 }
   0x2   :  { %s1912_s11 = scalar_lea.vmem %s16_s10, 4352  ;;  %p1917_p1 = scmp.lt.s32.totalorder %s16_s10, %s16_s10 }
   0x3   :  { %p1913_p0 = scmp.ne.s32.totalorder %s16_s10, %s1912_s11  ;;  %p1918_p2 = scmp.lt.s32.totalorder %s1912_s11, %s1912_s11 }
   0x5   :  { %p1919_p3 = por %p1918_p2, %p1917_p1 }
   0x7   :  { %p1920_p4 = pnand %p1919_p3, %p1913_p0 }
   0x9   :  { %1923 = shalt.err (!%p1920_p4)
}
   0xa   :  { %s1927_s12 = smov 128   ;;  %s1928_s13 = smov 8  }
   0xb   :  { %21 = dma.hbm_to_vmem [thread:$0]  %s2130_s1, 4352, %s16_s10, [#allocation4], %s1927_s12, %s1927_s12, %s1928_s13  }
   0xc   :  { %1924 = dma.done.wait [#allocation4], 4352  }
   0xd   :  { %1925 = vsyncadd [#allocation4], 4294962944  ;;  %v1929_v0 = vmov 0.0   ;;  %vm69_vm0 = vcmask 58368   ;;  %vm1930_vm1 = vmmov 0   ;;  %vm30_vm2 = vcmask 64512  }
   0xe   :  { %1770 = vmatprep.subr.mxu0 %v1929_v0  ;;  %25 = vst [vmem:[%s2131_s2] sm:$0xff] %v1929_v0  ;;  %26 = vst [vmem:[%s2131_s2 + $0x8] sm:$0x3] %v1929_v0  ;;  %1775 = vmatprep.subr.mxu1 %v1929_v0  ;;  %v75_v1 = vld [vmem:[#allocation3 + $0x2] sm:$0xff]  ;;  %v155_v2 = vld [vmem:[#allocation3 + $0xa] sm:$0xff]  ;;  %v59_v25 = vlaneseq  ;;  %vm313_vm3 = vcmask 123904   ;;  %vm378_vm4 = vcmask 130048  }
   0xf   :  { %1772 = vmatprep.mubr.msk.f32.mxu0 %vm1930_vm1, %v1929_v0  ;;  %1777 = vmatprep.mubr.msk.f32.mxu1 %vm1930_vm1, %v1929_v0  ;;  %70 = vst.msk [vmem:[#allocation2] sm:$0x3] %vm69_vm0, %v1929_v0  ;;  %71 = vst.msk [vmem:[#allocation2 + $0xa] sm:$0x3] %vm69_vm0, %v1929_v0  ;;  %v27_v3 = vld [vmem:[%s2129_s0] sm:$0xff]  ;;  %v458_v42 = vld [vmem:[#allocation3 + $0x45] sm:$0xff] }
  0x10   :  { %1771 = vmatpush3.msra.mxu0 %v75_v1  ;;  %1776 = vmatpush3.msra.mxu1 %v155_v2  ;;  %v31_v4 = vsel %vm30_vm2, %v27_v3, 0.0  ;;  %v39_v5 = vmul.f32 %v27_v3, %v27_v3  ;;  %v60_v26 = vshrl.u32 %v59_v25, 7  ;;  %v28_v27 = vld [vmem:[#allocation3] sm:$0x1]  ;;  %v29_v31 = vld [vmem:[#allocation3 + $0x1] sm:$0x1] }
  0x11   :  { %1780 = vmatprep.subr.mxu0 %v1929_v0  ;;  %v32_v6 = vrot.slane %v31_v4, 4  ;;  %1785 = vmatprep.subr.mxu1 %v1929_v0  ;;  %v231_v38 = vld [vmem:[#allocation3 + $0x12] sm:$0xff]  ;;  %v377_v43 = vld [vmem:[#allocation3 + $0x25] sm:$0xff]  ;;  %v457_v44 = vld [vmem:[#allocation3 + $0x3d] sm:$0xff]  ;;  %vm1306_vm5 = vcmask 125952  }
  0x12   :  { %v40_v7 = vsel %vm30_vm2, %v39_v5, 0.0  ;;  %v1974_v28 = vsub.s32 0, %v60_v26  ;;  %v376_v45 = vld [vmem:[#allocation3 + $0x1d] sm:$0xff]  ;;  %v1699_v46 = vld [vmem:[#allocation3 + $0x1a] ss:$0 sm:$0xff] }
  0x13   :  { %v33_v8 = vadd.f32 %v32_v6, %v31_v4  ;;  %v41_v9 = vrot.slane %v40_v7, 4 }
  0x15   :  { %v34_v10 = vrot.slane %v33_v8, 2  ;;  %v42_v11 = vadd.f32 %v41_v9, %v40_v7 }
  0x17   :  { %v35_v12 = vadd.f32 %v34_v10, %v33_v8  ;;  %v43_v13 = vrot.slane %v42_v11, 2 }
  0x19   :  { %v36_v14 = vrot.slane %v35_v12, 1  ;;  %v44_v15 = vadd.f32 %v43_v13, %v42_v11 }
  0x1b   :  { %v37_v16 = vadd.f32 %v36_v14, %v35_v12  ;;  %v45_v17 = vrot.slane %v44_v15, 1 }
  0x1d   :  { %v46_v18 = vadd.f32 %v45_v17, %v44_v15  ;;  %v49_v19 = vmul.f32 0.125, %v37_v16 }
  0x1f   :  { %v50_v20 = vmul.f32 0.125, %v46_v18  ;;  %v51_v21 = vmul.f32 %v49_v19, %v49_v19 }
  0x21   :  { %v52_v22 = vsub.f32 %v50_v20, %v51_v21 }
  0x23   :  { %v53_v23 = vmax.f32 %v52_v22, 0.0 }
  0x25   :  { %v54_v24 = vadd.f32 1e-05, %v53_v23 }
  0x27   :  { %1888 = vrsqrt.f32 %v54_v24 }
  0x34   :  { %v1889_v29 = vpop.eup %1888 }
  0x35   :  { %v56_v30 = vmul.f32 %v1889_v29, %v28_v27 }
  0x37   :  { %v57_v32 = vmul.f32 %v56_v30, %v49_v19  ;;  %v62_v33 = vrot.slane %v56_v30, %v1974_v28 }
  0x39   :  { %v58_v34 = vsub.f32 %v29_v31, %v57_v32  ;;  %v63_v35 = vmul.f32 %v62_v33, %v27_v3 }
  0x3b   :  { %v67_v36 = vrot.slane %v58_v34, %v1974_v28 }
  0x3d   :  { %v68_v37 = vadd.f32 %v67_v36, %v63_v35  ;;  %v311_v36 = vld [vmem:[#allocation3 + $0x1b] sm:$0x1] }
  0x3f   :  { %72 = vst.msk [vmem:[#allocation2 + $0x2] sm:$0xff] %vm30_vm2, %v68_v37 }
  0x46   :  { %v74_v39 = vld [vmem:[#allocation2] sm:$0xff] }
  0x47   :  { %v154_v40 = vld [vmem:[#allocation2 + $0x2] sm:$0xff]  ;;  %1773 = vmatmul.mubr.msk.f32.vlgmr.msra.gmra.mxu0 %vm30_vm2, %v74_v39  ;;  %1063 = vst.msk [vmem:[#allocation2] sm:$0x3] %vm313_vm3, %v1929_v0  ;;  %v312_v39 = vld [vmem:[#allocation3 + $0x1c] sm:$0x1] }
  0x48   :  { %v230_v41 = vld [vmem:[#allocation2 + $0x4] sm:$0xff]  ;;  %1778 = vmatmul.mubr.msk.f32.vlgmr.msra.gmra.mxu1 %vm30_vm2, %v154_v40  ;;  %1781 = vmatpush3.msra.mxu0 %v231_v38 }
  0x49   :  { %1064 = vst.msk [vmem:[#allocation2 + $0x6] sm:$0x3] %vm313_vm3, %v1929_v0  ;;  %1782 = vmatprep.mubr.msk.f32.mxu0 %vm1930_vm1, %v1929_v0  ;;  %1792 = vmatprep.subr.mxu0 %v1929_v0 }
  0x4a   :  { %1789 = vmatprep.mubr.msk.f32.mxu1 %vm1930_vm1, %v1929_v0  ;;  %1786 = vmatpush3.msra.mxu1 %v377_v43 }
  0x4b   :  { %1783 = vmatmul.mubr.msk.f32.vlgmr.msra.gmra.mxu0 %vm30_vm2, %v230_v41  ;;  %1787 = vmatprep.subr.mxu1 %v1929_v0 }
  0x4c   :  { %1796 = vmatprep.mubr.msk.f32.mxu0 %vm1930_vm1, %v1929_v0  ;;  %1793 = vmatpush3.msra.mxu0 %v458_v42 }
  0x4d   :  { %1794 = vmatprep.subr.mxu0 %v1929_v0  ;;  %1788 = vmatpush3.msra.mxu1 %v376_v45 }
  0x4e   :  { %1795 = vmatpush3.msra.mxu0 %v457_v44  ;;  %1799 = vmatprep.subr.mxu1 %v1929_v0 }
  0x4f   :  { %1806 = vmatprep.subr.mxu0 %v1929_v0 }
 0x107   :  { %v145_v47 = vpop.f32.mrf.mxu0 }
 0x108   :  { %v225_v48 = vpop.f32.mrf.mxu1  ;;  %v153_v49 = vadd.f32 %v1699_v46, %v145_v47  ;;  %v611_v46 = vld [vmem:[#allocation3 + $0x55] sm:$0xff] }
 0x109   :  { %v1774_v50 = vpop.f32.mrf.mxu0  ;;  %v535_v47 = vld [vmem:[#allocation3 + $0x35] sm:$0xff] }
 0x10a   :  { %v1779_v51 = vpop.f32.mrf.mxu1  ;;  %v229_v52 = vadd.f32 %v225_v48, %v153_v49  ;;  %v610_v48 = vld [vmem:[#allocation3 + $0x4d] sm:$0xff] }
 0x10b   :  { %v301_v53 = vpop.f32.mrf.mxu0  ;;  %v534_v49 = vld [vmem:[#allocation3 + $0x2d] sm:$0xff] }
 0x10c   :  { %v305_v54 = vadd.f32 %v301_v53, %v229_v52  ;;  %v773_v51 = vld [vmem:[#allocation3 + $0x87] sm:$0xff]  ;;  %v772_v53 = vld [vmem:[#allocation3 + $0x7f] sm:$0xff] }
 0x10d   :  { %v1784_v55 = vpop.f32.mrf.mxu0  ;;  %v696_v52 = vld [vmem:[#allocation3 + $0x67] sm:$0xff] }
 0x10e   :  { %v306_v56 = vmax.f32 %v305_v54, 0.0  ;;  %v695_v54 = vld [vmem:[#allocation3 + $0x5f] sm:$0xff]  ;;  %v923_v55 = vld [vmem:[#allocation3 + $0x97] sm:$0xff] }
 0x110   :  { %v308_v57 = vrot.slane %v306_v56, 2 }
 0x112   :  { %v310_v58 = vmax.f32 %v306_v56, %v308_v57  ;;  %v850_v56 = vld [vmem:[#allocation3 + $0x77] sm:$0xff]  ;;  %v922_v57 = vld [vmem:[#allocation3 + $0x8f] sm:$0xff] }
 0x114   :  { %v314_v59 = vsel %vm313_vm3, %v310_v58, 0.0  ;;  %v323_v60 = vrot.slane %v310_v58, 4  ;;  %v333_v61 = vmul.f32 %v310_v58, %v310_v58 }
 0x115   :  { %v315_v62 = vrot.slane %v314_v59, 4 }
 0x116   :  { %v325_v63 = vsel %vm313_vm3, %v323_v60, 0.0  ;;  %v334_v1 = vsel %vm313_vm3, %v333_v61, 0.0  ;;  %v343_v2 = vrot.slane %v333_v61, 4  ;;  %v1151_v60 = vld [vmem:[#allocation3 + $0xbb] sm:$0xff]  ;;  %v1069_v61 = vld [vmem:[#allocation3 + $0xa3] sm:$0xff] }
 0x117   :  { %v316_v3 = vadd.f32 %v315_v62, %v314_v59  ;;  %v326_v4 = vrot.slane %v325_v63, 4  ;;  %v335_v5 = vrot.slane %v334_v1, 4  ;;  %v1070_v59 = vld [vmem:[#allocation3 + $0xab] sm:$0xff]  ;;  %v1150_v62 = vld [vmem:[#allocation3 + $0xb3] sm:$0xff] }
 0x118   :  { %v345_v6 = vsel %vm313_vm3, %v343_v2, 0.0  ;;  %v1703_v2 = vld [vmem:[#allocation3 + $0x5d] ss:$0 sm:$0xff] }
 0x119   :  { %v317_v7 = vrot.slane %v316_v3, 2  ;;  %v327_v8 = vadd.f32 %v326_v4, %v325_v63  ;;  %v336_v9 = vadd.f32 %v335_v5, %v334_v1  ;;  %v346_v10 = vrot.slane %v345_v6, 4 }
 0x11b   :  { %v318_v11 = vadd.f32 %v317_v7, %v316_v3  ;;  %v328_v12 = vrot.slane %v327_v8, 2  ;;  %v337_v13 = vrot.slane %v336_v9, 2  ;;  %v347_v14 = vadd.f32 %v346_v10, %v345_v6  ;;  %v1705_v3 = vld [vmem:[#allocation3 + $0x5e] ss:$0 sm:$0xff] }
 0x11d   :  { %v319_v15 = vrot.slane %v318_v11, 1  ;;  %v329_v16 = vadd.f32 %v328_v12, %v327_v8  ;;  %v338_v17 = vadd.f32 %v337_v13, %v336_v9  ;;  %v348_v18 = vrot.slane %v347_v14, 2 }
 0x11f   :  { %v330_v19 = vrot.slane %v329_v16, 1  ;;  %v339_v20 = vrot.slane %v338_v17, 1  ;;  %v349_v21 = vadd.f32 %v348_v18, %v347_v14  ;;  %v320_v22 = vadd.f32 %v319_v15, %v318_v11 }
 0x121   :  { %v331_v23 = vadd.f32 %v330_v19, %v329_v16  ;;  %v350_v24 = vrot.slane %v349_v21, 1  ;;  %v340_v26 = vadd.f32 %v339_v20, %v338_v17  ;;  %v1709_v19 = vld [vmem:[#allocation3 + $0x9f] ss:$0 sm:$0xff]  ;;  %v1711_v20 = vld [vmem:[#allocation3 + $0xa0] ss:$0 sm:$0xff] }
 0x123   :  { %v332_v25 = vadd.f32 %v331_v23, %v320_v22  ;;  %v351_v27 = vadd.f32 %v350_v24, %v349_v21 }
 0x125   :  { %v352_v29 = vadd.f32 %v351_v27, %v340_v26  ;;  %v354_v30 = vmul.f32 0.25, %v332_v25 }
 0x127   :  { %v355_v31 = vmul.f32 0.25, %v352_v29  ;;  %v356_v32 = vmul.f32 %v354_v30, %v354_v30 }
 0x129   :  { %v357_v33 = vsub.f32 %v355_v31, %v356_v32 }
 0x12b   :  { %v358_v34 = vmax.f32 %v357_v33, 0.0 }
 0x12d   :  { %v359_v35 = vadd.f32 1e-05, %v358_v34 }
 0x12f   :  { %1890 = vrsqrt.f32 %v359_v35 }
 0x13c   :  { %v1891_v37 = vpop.eup %1890 }
 0x13d   :  { %v361_v38 = vmul.f32 %v1891_v37, %v311_v36  ;;  %v685_v37 = vld [vmem:[%s2129_s0 + $0x8] sm:$0x3] }
 0x13f   :  { %v362_v40 = vmul.f32 %v361_v38, %v354_v30  ;;  %v367_v41 = vrot.slane %v361_v38, %v1974_v28 }
 0x141   :  { %v363_v42 = vsub.f32 %v312_v39, %v362_v40  ;;  %v368_v43 = vmul.f32 %v367_v41, %v310_v58  ;;  %v849_v58 = vld [vmem:[#allocation3 + $0x6f] sm:$0xff] }
 0x143   :  { %v372_v44 = vrot.slane %v363_v42, %v1974_v28 }
 0x145   :  { %v373_v45 = vadd.f32 %v372_v44, %v368_v43 }
 0x147   :  { %1790 = vmatmul.mubr.msk.f32.vlgmr.msra.gmra.mxu1 %vm378_vm4, %v373_v45  ;;  %1797 = vmatmul.mubr.msk.f32.vlgmr.msra.gmra.mxu0 %vm378_vm4, %v373_v45  ;;  %v536_v50 = vrot.slane %v373_v45, 4 }
 0x148   :  { %1807 = vmatpush3.msra.mxu0 %v611_v46  ;;  %1800 = vmatpush3.msra.mxu1 %v535_v47  ;;  %v997_v46 = vld [vmem:[%s2129_s0 + $0xa] sm:$0x3] }
 0x149   :  { %1808 = vmatprep.subr.mxu0 %v1929_v0  ;;  %1801 = vmatprep.subr.mxu1 %v1929_v0 }
 0x14a   :  { %1809 = vmatpush3.msra.mxu0 %v610_v48  ;;  %1802 = vmatpush3.msra.mxu1 %v534_v49 }
 0x14b   :  { %1803 = vmatprep.mubr.msk.f32.mxu1 %vm1930_vm1, %v1929_v0  ;;  %1810 = vmatprep.mubr.msk.f32.mxu0 %vm1930_vm1, %v1929_v0 }
 0x14c   :  { %1820 = vmatprep.subr.mxu0 %v1929_v0  ;;  %1804 = vmatmul.mubr.msk.f32.vlgmr.msra.gmra.mxu1 %vm378_vm4, %v536_v50 }
 0x14d   :  { %1811 = vmatmul.mubr.msk.f32.vlgmr.msra.gmra.mxu0 %vm378_vm4, %v536_v50  ;;  %1813 = vmatprep.subr.mxu1 %v1929_v0 }
 0x14e   :  { %1821 = vmatpush3.msra.mxu0 %v773_v51  ;;  %1814 = vmatpush3.msra.mxu1 %v696_v52 }
 0x14f   :  { %1822 = vmatprep.subr.mxu0 %v1929_v0  ;;  %1815 = vmatprep.subr.mxu1 %v1929_v0 }
 0x150   :  { %1823 = vmatpush3.msra.mxu0 %v772_v53  ;;  %1816 = vmatpush3.msra.mxu1 %v695_v54 }
 0x151   :  { %1817 = vmatprep.mubr.msk.f32.mxu1 %vm1930_vm1, %v1929_v0  ;;  %1824 = vmatprep.mubr.msk.f32.mxu0 %vm1930_vm1, %v1929_v0 }
 0x152   :  { %1834 = vmatprep.subr.mxu0 %v1929_v0  ;;  %1818 = vmatmul.mubr.msk.f32.vlgmr.msra.gmra.mxu1 %vm378_vm4, %v373_v45 }
 0x153   :  { %1825 = vmatmul.mubr.msk.f32.vlgmr.msra.gmra.mxu0 %vm378_vm4, %v373_v45  ;;  %1827 = vmatprep.subr.mxu1 %v1929_v0 }
 0x154   :  { %1835 = vmatpush3.msra.mxu0 %v923_v55  ;;  %1828 = vmatpush3.msra.mxu1 %v850_v56 }
 0x155   :  { %1836 = vmatprep.subr.mxu0 %v1929_v0  ;;  %1829 = vmatprep.subr.mxu1 %v1929_v0 }
 0x156   :  { %1837 = vmatpush3.msra.mxu0 %v922_v57  ;;  %1830 = vmatpush3.msra.mxu1 %v849_v58 }
 0x157   :  { %1831 = vmatprep.mubr.msk.f32.mxu1 %vm1930_vm1, %v1929_v0  ;;  %1838 = vmatprep.mubr.msk.f32.mxu0 %vm1930_vm1, %v1929_v0 }
 0x158   :  { %1832 = vmatmul.mubr.msk.f32.vlgmr.msra.gmra.mxu1 %vm378_vm4, %v536_v50  ;;  %1839 = vmatmul.mubr.msk.f32.vlgmr.msra.gmra.mxu0 %vm378_vm4, %v536_v50 }
 0x159   :  { %1841 = vmatprep.subr.mxu1 %v1929_v0  ;;  %1848 = vmatprep.subr.mxu0 %v1929_v0 }
 0x15a   :  { %1845 = vmatprep.mubr.msk.f32.mxu1 %vm1930_vm1, %v1929_v0  ;;  %1852 = vmatprep.mubr.msk.f32.mxu0 %vm1930_vm1, %v1929_v0 }
 0x15b   :  { %1842 = vmatpush3.msra.mxu1 %v1070_v59  ;;  %1849 = vmatpush3.msra.mxu0 %v1151_v60 }
 0x15c   :  { %1843 = vmatprep.subr.mxu1 %v1929_v0  ;;  %1850 = vmatprep.subr.mxu0 %v1929_v0 }
 0x15d   :  { %1844 = vmatpush3.msra.mxu1 %v1069_v61  ;;  %1851 = vmatpush3.msra.mxu0 %v1150_v62 }
 0x15e   :  { %1855 = vmatprep.subr.mxu1 %v1929_v0  ;;  %1862 = vmatprep.subr.mxu0 %v1929_v0 }
 0x207   :  { %v448_v63 = vpop.f32.mrf.mxu1  ;;  %v525_v1 = vpop.f32.mrf.mxu0 }
 0x208   :  { %v456_v6 = vadd.f32 %v1703_v2, %v448_v63  ;;  %v533_v7 = vadd.f32 %v1705_v3, %v525_v1 }
 0x209   :  { %v1791_v4 = vpop.f32.mrf.mxu1  ;;  %v1798_v5 = vpop.f32.mrf.mxu0 }
 0x20c   :  { %v605_v8 = vpop.f32.mrf.mxu1 }
 0x20d   :  { %v609_v9 = vadd.f32 %v605_v8, %v456_v6  ;;  %v678_v10 = vpop.f32.mrf.mxu0 }
 0x20e   :  { %v682_v11 = vadd.f32 %v678_v10, %v533_v7  ;;  %v1805_v12 = vpop.f32.mrf.mxu1 }
 0x20f   :  { %691 = vst.msk [vmem:[%s2131_s2 + $0x2] sm:$0x3] %vm313_vm3, %v609_v9  ;;  %v1812_v13 = vpop.f32.mrf.mxu0 }
 0x210   :  { %v683_v14 = vmax.f32 %v682_v11, -30.0 }
 0x212   :  { %v684_v15 = vmin.f32 %v683_v14, 20.0  ;;  %v763_v16 = vpop.f32.mrf.mxu1 }
 0x213   :  { %v840_v17 = vpop.f32.mrf.mxu0  ;;  %v771_v24 = vadd.f32 %v1709_v19, %v763_v16 }
 0x214   :  { %v686_v18 = vmul.f32 0.5, %v684_v15  ;;  %692 = vst.msk [vmem:[%s2131_s2 + $0x6] sm:$0x3] %vm313_vm3, %v684_v15  ;;  %v1819_v21 = vpop.f32.mrf.mxu1  ;;  %v848_v25 = vadd.f32 %v1711_v20, %v840_v17  ;;  %v1005_v20 = vld [vmem:[#allocation3 + $0xa1] sm:$0x1] }
 0x215   :  { %v1826_v22 = vpop.f32.mrf.mxu0 }
 0x216   :  { %v687_v23 = vmul.f32 1.442695, %v686_v18 }
 0x218   :  { %1892 = vpow2.f32 %v687_v23  ;;  %v917_v26 = vpop.f32.mrf.mxu1  ;;  %v990_v27 = vpop.f32.mrf.mxu0  ;;  %v1006_v23 = vld [vmem:[#allocation3 + $0xa2] sm:$0x1] }
 0x219   :  { %v921_v29 = vadd.f32 %v917_v26, %v771_v24  ;;  %v994_v30 = vadd.f32 %v990_v27, %v848_v25 }
 0x21a   :  { %v1833_v31 = vpop.f32.mrf.mxu1  ;;  %v1840_v32 = vpop.f32.mrf.mxu0 }
 0x21b   :  { %1003 = vst.msk [vmem:[%s2131_s2 + $0x4] sm:$0x3] %vm313_vm3, %v921_v29  ;;  %v995_v33 = vmax.f32 %v994_v30, -30.0 }
 0x21d   :  { %v996_v34 = vmin.f32 %v995_v33, 20.0  ;;  %v1228_v33 = vld [vmem:[#allocation3 + $0xcb] sm:$0xff] }
 0x21f   :  { %v998_v35 = vmul.f32 0.5, %v996_v34  ;;  %1004 = vst.msk [vmem:[%s2131_s2 + $0x8] sm:$0x3] %vm313_vm3, %v996_v34 }
 0x221   :  { %v999_v36 = vmul.f32 1.442695, %v998_v35 }
 0x223   :  { %1894 = vpow2.f32 %v999_v36 }
 0x225   :  { %v1893_v38 = vpop.eup %1892 }
 0x226   :  { %v689_v39 = vmul.f32 %v1893_v38, %v685_v37  ;;  %v1227_v37 = vld [vmem:[#allocation3 + $0xc3] sm:$0xff] }
 0x227   :  { %v1414_v38 = vld [vmem:[#allocation3 + $0xe0] sm:$0xff] }
 0x228   :  { %v2062_v40 = vadd.f32 %v689_v39, %v609_v9  ;;  %v1495_v39 = vld [vmem:[#allocation3 + $0xf0] sm:$0xff] }
 0x22a   :  { %v1007_v41 = vsel %vm313_vm3, %v2062_v40, 0.0  ;;  %v1023_v42 = vmul.f32 %v2062_v40, %v2062_v40 }
 0x22b   :  { %v1008_v43 = vrot.slane %v1007_v41, 4 }
 0x22c   :  { %v1024_v44 = vsel %vm313_vm3, %v1023_v42, 0.0  ;;  %v1494_v42 = vld [vmem:[#allocation3 + $0xe8] sm:$0xff] }
 0x22d   :  { %v1025_v45 = vrot.slane %v1024_v44, 4  ;;  %v1009_v48 = vadd.f32 %v1008_v43, %v1007_v41  ;;  %v1413_v41 = vld [vmem:[#allocation3 + $0xd8] sm:$0xff]  ;;  %v1715_v43 = vld [vmem:[#allocation3 + $0xd3] ss:$0 sm:$0xff] }
 0x22f   :  { %v1026_v50 = vadd.f32 %v1025_v45, %v1024_v44  ;;  %v1010_v52 = vrot.slane %v1009_v48, 2 }
 0x230   :  { %v1895_v47 = vpop.eup %1894 }
 0x231   :  { %v1001_v49 = vmul.f32 %v1895_v47, %v997_v46  ;;  %v1027_v55 = vrot.slane %v1026_v50, 2  ;;  %v1011_v58 = vadd.f32 %v1010_v52, %v1009_v48 }
 0x233   :  { %v2072_v51 = vadd.f32 %v1001_v49, %v921_v29  ;;  %v1028_v61 = vadd.f32 %v1027_v55, %v1026_v50  ;;  %v1012_v1 = vrot.slane %v1011_v58, 1 }
 0x235   :  { %v1015_v53 = vsel %vm313_vm3, %v2072_v51, 0.0  ;;  %v1032_v54 = vmul.f32 %v2072_v51, %v2072_v51  ;;  %v1029_v4 = vrot.slane %v1028_v61, 1  ;;  %v1013_v7 = vadd.f32 %v1012_v1, %v1011_v58 }
 0x236   :  { %v1016_v56 = vrot.slane %v1015_v53, 4 }
 0x237   :  { %v1033_v57 = vsel %vm313_vm3, %v1032_v54, 0.0  ;;  %v1030_v10 = vadd.f32 %v1029_v4, %v1028_v61 }
 0x238   :  { %v1017_v59 = vadd.f32 %v1016_v56, %v1015_v53  ;;  %v1034_v60 = vrot.slane %v1033_v57, 4 }
 0x23a   :  { %v1018_v62 = vrot.slane %v1017_v59, 2  ;;  %v1035_v63 = vadd.f32 %v1034_v60, %v1033_v57 }
 0x23c   :  { %v1019_v2 = vadd.f32 %v1018_v62, %v1017_v59  ;;  %v1036_v3 = vrot.slane %v1035_v63, 2 }
 0x23e   :  { %v1020_v5 = vrot.slane %v1019_v2, 1  ;;  %v1037_v6 = vadd.f32 %v1036_v3, %v1035_v63 }
 0x240   :  { %v1021_v8 = vadd.f32 %v1020_v5, %v1019_v2  ;;  %v1038_v9 = vrot.slane %v1037_v6, 1 }
 0x242   :  { %v1022_v11 = vadd.f32 %v1021_v8, %v1013_v7  ;;  %v1039_v12 = vadd.f32 %v1038_v9, %v1037_v6 }
 0x244   :  { %v1040_v13 = vadd.f32 %v1039_v12, %v1030_v10  ;;  %v1041_v14 = vmul.f32 0.25, %v1022_v11 }
 0x246   :  { %v1042_v15 = vmul.f32 0.25, %v1040_v13  ;;  %v1043_v16 = vmul.f32 %v1041_v14, %v1041_v14  ;;  %v1304_v13 = vld [vmem:[#allocation3 + $0xd4] sm:$0x1] }
 0x248   :  { %v1044_v17 = vsub.f32 %v1042_v15, %v1043_v16  ;;  %v1305_v16 = vld [vmem:[#allocation3 + $0xd5] sm:$0x1] }
 0x24a   :  { %v1045_v18 = vmax.f32 %v1044_v17, 0.0 }
 0x24c   :  { %v1046_v19 = vadd.f32 1e-05, %v1045_v18 }
 0x24e   :  { %1896 = vrsqrt.f32 %v1046_v19 }
 0x25b   :  { %v1897_v21 = vpop.eup %1896 }
 0x25c   :  { %v1048_v22 = vmul.f32 %v1897_v21, %v1005_v20 }
 0x25e   :  { %v1049_v24 = vmul.f32 %v1048_v22, %v1041_v14  ;;  %v1054_v25 = vrot.slane %v1048_v22, %v1974_v28 }
 0x260   :  { %v1050_v26 = vsub.f32 %v1006_v23, %v1049_v24  ;;  %v1055_v27 = vmul.f32 %v1054_v25, %v2062_v40  ;;  %v1061_v30 = vmul.f32 %v1054_v25, %v2072_v51 }
 0x262   :  { %v1059_v29 = vrot.slane %v1050_v26, %v1974_v28 }
 0x264   :  { %v1060_v31 = vadd.f32 %v1059_v29, %v1055_v27  ;;  %v1062_v32 = vadd.f32 %v1061_v30, %v1059_v29 }
 0x266   :  { %1065 = vst.msk [vmem:[#allocation2 + $0x2] sm:$0x3] %vm313_vm3, %v1060_v31  ;;  %1066 = vst.msk [vmem:[#allocation2 + $0x4] sm:$0x3] %vm313_vm3, %v1062_v32 }
 0x26d   :  { %v1068_v34 = vld [vmem:[#allocation2] sm:$0xf]  ;;  %v1226_v36 = vld [vmem:[#allocation2 + $0x4] sm:$0xf] }
 0x26e   :  { %v1149_v35 = vld [vmem:[#allocation2 + $0x2] sm:$0xf]  ;;  %1846 = vmatmul.mubr.msk.f32.vlgmr.msra.gmra.mxu1 %vm378_vm4, %v1068_v34  ;;  %1407 = vst.msk [vmem:[#allocation2] sm:$0x3] %vm313_vm3, %v1929_v0  ;;  %1408 = vst.msk [vmem:[#allocation2 + $0x6] sm:$0x3] %vm313_vm3, %v1929_v0 }
 0x26f   :  { %1853 = vmatmul.mubr.msk.f32.vlgmr.msra.gmra.mxu0 %vm378_vm4, %v1149_v35  ;;  %1856 = vmatpush3.msra.mxu1 %v1228_v33 }
 0x270   :  { %1859 = vmatprep.mubr.msk.f32.mxu1 %vm1930_vm1, %v1929_v0  ;;  %1857 = vmatprep.subr.mxu1 %v1929_v0 }
 0x271   :  { %1866 = vmatprep.mubr.msk.f32.mxu0 %vm1930_vm1, %v1929_v0  ;;  %1858 = vmatpush3.msra.mxu1 %v1227_v37 }
 0x272   :  { %1860 = vmatmul.mubr.msk.f32.vlgmr.msra.gmra.mxu1 %vm378_vm4, %v1226_v36  ;;  %1869 = vmatprep.subr.mxu1 %v1929_v0 }
 0x273   :  { %1873 = vmatprep.mubr.msk.f32.mxu1 %vm1930_vm1, %v1929_v0  ;;  %1863 = vmatpush3.msra.mxu0 %v1414_v38 }
 0x274   :  { %1870 = vmatpush3.msra.mxu1 %v1495_v39  ;;  %1864 = vmatprep.subr.mxu0 %v1929_v0 }
 0x275   :  { %1871 = vmatprep.subr.mxu1 %v1929_v0  ;;  %1865 = vmatpush3.msra.mxu0 %v1413_v41 }
 0x276   :  { %1872 = vmatpush3.msra.mxu1 %v1494_v42  ;;  %1876 = vmatprep.subr.mxu0 %v1929_v0 }
 0x32e   :  { %v1140_v44 = vpop.f32.mrf.mxu1 }
 0x32f   :  { %v1221_v45 = vpop.f32.mrf.mxu0  ;;  %v1148_v46 = vadd.f32 %v1715_v43, %v1140_v44 }
 0x330   :  { %v1847_v47 = vpop.f32.mrf.mxu1 }
 0x331   :  { %v1854_v48 = vpop.f32.mrf.mxu0  ;;  %v1225_v49 = vadd.f32 %v1221_v45, %v1148_v46 }
 0x332   :  { %v1298_v50 = vpop.f32.mrf.mxu1 }
 0x333   :  { %v1302_v52 = vadd.f32 %v1298_v50, %v1225_v49 }
 0x334   :  { %v1861_v53 = vpop.f32.mrf.mxu1 }
 0x335   :  { %v1303_v54 = vmax.f32 %v1302_v52, 0.0 }
 0x337   :  { %v1307_v55 = vsel %vm1306_vm5, %v1303_v54, 0.0  ;;  %v1315_v56 = vmul.f32 %v1303_v54, %v1303_v54 }
 0x338   :  { %v1308_v57 = vrot.slane %v1307_v55, 4 }
 0x339   :  { %v1316_v58 = vsel %vm1306_vm5, %v1315_v56, 0.0 }
 0x33a   :  { %v1309_v59 = vadd.f32 %v1308_v57, %v1307_v55  ;;  %v1317_v60 = vrot.slane %v1316_v58, 4 }
 0x33c   :  { %v1310_v61 = vrot.slane %v1309_v59, 2  ;;  %v1318_v62 = vadd.f32 %v1317_v60, %v1316_v58 }
 0x33e   :  { %v1311_v63 = vadd.f32 %v1310_v61, %v1309_v59  ;;  %v1319_v1 = vrot.slane %v1318_v62, 2 }
 0x340   :  { %v1312_v2 = vrot.slane %v1311_v63, 1  ;;  %v1320_v3 = vadd.f32 %v1319_v1, %v1318_v62 }
 0x342   :  { %v1313_v4 = vadd.f32 %v1312_v2, %v1311_v63  ;;  %v1321_v5 = vrot.slane %v1320_v3, 1  ;;  %v1349_v2 = vld [vmem:[#allocation3 + $0xd6] sm:$0x1] }
 0x344   :  { %v1322_v6 = vadd.f32 %v1321_v5, %v1320_v3  ;;  %v1324_v7 = vmul.f32 0.25, %v1313_v4  ;;  %v1350_v5 = vld [vmem:[#allocation3 + $0xd7] sm:$0x1] }
 0x346   :  { %v1325_v8 = vmul.f32 0.25, %v1322_v6  ;;  %v1326_v9 = vmul.f32 %v1324_v7, %v1324_v7 }
 0x348   :  { %v1327_v10 = vsub.f32 %v1325_v8, %v1326_v9 }
 0x34a   :  { %v1328_v11 = vmax.f32 %v1327_v10, 0.0 }
 0x34c   :  { %v1329_v12 = vadd.f32 1e-05, %v1328_v11 }
 0x34e   :  { %1898 = vrsqrt.f32 %v1329_v12 }
 0x35b   :  { %v1899_v14 = vpop.eup %1898 }
 0x35c   :  { %v1331_v15 = vmul.f32 %v1899_v14, %v1304_v13  ;;  %v1572_v14 = vld [vmem:[#allocation3 + $0x100] sm:$0xff] }
 0x35e   :  { %v1332_v17 = vmul.f32 %v1331_v15, %v1324_v7  ;;  %v1337_v18 = vrot.slane %v1331_v15, %v1974_v28 }
 0x360   :  { %v1333_v19 = vsub.f32 %v1305_v16, %v1332_v17  ;;  %v1338_v20 = vmul.f32 %v1337_v18, %v1303_v54  ;;  %v1571_v17 = vld [vmem:[#allocation3 + $0xf8] sm:$0xff] }
 0x362   :  { %v1342_v21 = vrot.slane %v1333_v19, %v1974_v28  ;;  %v1719_v19 = vld [vmem:[#allocation3 + $0x108] ss:$0 sm:$0xff] }
 0x364   :  { %v1343_v22 = vadd.f32 %v1342_v21, %v1338_v20 }
 0x366   :  { %v1344_v23 = vadd.f32 %v1343_v22, %v2062_v40  ;;  %v1346_v24 = vrot.slane %v1343_v22, 2 }
 0x368   :  { %v1348_v25 = vadd.f32 %v1346_v24, %v2072_v51  ;;  %v1351_v26 = vsel %vm313_vm3, %v1344_v23, 0.0  ;;  %v1367_v27 = vmul.f32 %v1344_v23, %v1344_v23 }
 0x369   :  { %v1352_v29 = vrot.slane %v1351_v26, 4 }
 0x36a   :  { %v1359_v30 = vsel %vm313_vm3, %v1348_v25, 0.0  ;;  %v1368_v31 = vsel %vm313_vm3, %v1367_v27, 0.0  ;;  %v1376_v32 = vmul.f32 %v1348_v25, %v1348_v25 }
 0x36b   :  { %v1353_v33 = vadd.f32 %v1352_v29, %v1351_v26  ;;  %v1360_v34 = vrot.slane %v1359_v30, 4  ;;  %v1369_v35 = vrot.slane %v1368_v31, 4 }
 0x36c   :  { %v1377_v36 = vsel %vm313_vm3, %v1376_v32, 0.0 }
 0x36d   :  { %v1354_v37 = vrot.slane %v1353_v33, 2  ;;  %v1361_v38 = vadd.f32 %v1360_v34, %v1359_v30  ;;  %v1370_v40 = vadd.f32 %v1369_v35, %v1368_v31  ;;  %v1378_v39 = vrot.slane %v1377_v36, 4 }
 0x36f   :  { %v1355_v41 = vadd.f32 %v1354_v37, %v1353_v33  ;;  %v1362_v51 = vrot.slane %v1361_v38, 2  ;;  %v1371_v42 = vrot.slane %v1370_v40, 2  ;;  %v1379_v43 = vadd.f32 %v1378_v39, %v1377_v36 }
 0x371   :  { %v1356_v44 = vrot.slane %v1355_v41, 1  ;;  %v1363_v45 = vadd.f32 %v1362_v51, %v1361_v38  ;;  %v1372_v46 = vadd.f32 %v1371_v42, %v1370_v40  ;;  %v1380_v47 = vrot.slane %v1379_v43, 2 }
 0x373   :  { %v1364_v48 = vrot.slane %v1363_v45, 1  ;;  %v1373_v49 = vrot.slane %v1372_v46, 1  ;;  %v1381_v50 = vadd.f32 %v1380_v47, %v1379_v43  ;;  %v1357_v52 = vadd.f32 %v1356_v44, %v1355_v41 }
 0x375   :  { %v1365_v53 = vadd.f32 %v1364_v48, %v1363_v45  ;;  %v1382_v54 = vrot.slane %v1381_v50, 1  ;;  %v1374_v56 = vadd.f32 %v1373_v49, %v1372_v46 }
 0x377   :  { %v1366_v55 = vadd.f32 %v1365_v53, %v1357_v52  ;;  %v1383_v57 = vadd.f32 %v1382_v54, %v1381_v50  ;;  %v1652_v53 = vld [vmem:[#allocation3 + $0x109] sm:$0x1] }
 0x379   :  { %v1384_v58 = vadd.f32 %v1383_v57, %v1374_v56  ;;  %v1385_v59 = vmul.f32 0.25, %v1366_v55  ;;  %v1653_v56 = vld [vmem:[#allocation3 + $0x10a] sm:$0x1] }
 0x37b   :  { %v1386_v60 = vmul.f32 0.25, %v1384_v58  ;;  %v1387_v61 = vmul.f32 %v1385_v59, %v1385_v59 }
 0x37d   :  { %v1388_v62 = vsub.f32 %v1386_v60, %v1387_v61 }
 0x37f   :  { %v1389_v63 = vmax.f32 %v1388_v62, 0.0 }
 0x381   :  { %v1390_v1 = vadd.f32 1e-05, %v1389_v63 }
 0x383   :  { %1900 = vrsqrt.f32 %v1390_v1 }
 0x390   :  { %v1901_v3 = vpop.eup %1900 }
 0x391   :  { %v1392_v4 = vmul.f32 %v1901_v3, %v1349_v2 }
 0x393   :  { %v1393_v6 = vmul.f32 %v1392_v4, %v1385_v59  ;;  %v1398_v7 = vrot.slane %v1392_v4, %v1974_v28 }
 0x395   :  { %v1394_v8 = vsub.f32 %v1350_v5, %v1393_v6  ;;  %v1399_v9 = vmul.f32 %v1398_v7, %v1344_v23  ;;  %v1405_v11 = vmul.f32 %v1398_v7, %v1348_v25 }
 0x397   :  { %v1403_v10 = vrot.slane %v1394_v8, %v1974_v28 }
 0x399   :  { %v1404_v12 = vadd.f32 %v1403_v10, %v1399_v9  ;;  %v1406_v13 = vadd.f32 %v1405_v11, %v1403_v10 }
 0x39b   :  { %1409 = vst.msk [vmem:[#allocation2 + $0x2] sm:$0x3] %vm313_vm3, %v1404_v12  ;;  %1410 = vst.msk [vmem:[#allocation2 + $0x4] sm:$0x3] %vm313_vm3, %v1406_v13 }
 0x3a2   :  { %v1412_v15 = vld [vmem:[#allocation2] sm:$0xf]  ;;  %v1570_v18 = vld [vmem:[#allocation2 + $0x4] sm:$0xf] }
 0x3a3   :  { %v1493_v16 = vld [vmem:[#allocation2 + $0x2] sm:$0xf]  ;;  %1867 = vmatmul.mubr.msk.f32.vlgmr.msra.gmra.mxu0 %vm378_vm4, %v1412_v15 }
 0x3a4   :  { %1874 = vmatmul.mubr.msk.f32.vlgmr.msra.gmra.mxu1 %vm378_vm4, %v1493_v16  ;;  %1877 = vmatpush3.msra.mxu0 %v1572_v14 }
 0x3a5   :  { %1880 = vmatprep.mubr.msk.f32.mxu0 %vm1930_vm1, %v1929_v0  ;;  %1878 = vmatprep.subr.mxu0 %v1929_v0 }
 0x3a6   :  { %1879 = vmatpush3.msra.mxu0 %v1571_v17 }
 0x3a7   :  { %1881 = vmatmul.mubr.msk.f32.vlgmr.msra.gmra.mxu0 %vm378_vm4, %v1570_v18 }
 0x463   :  { %v1484_v20 = vpop.f32.mrf.mxu0 }
 0x464   :  { %v1565_v21 = vpop.f32.mrf.mxu1  ;;  %v1492_v22 = vadd.f32 %v1719_v19, %v1484_v20 }
 0x465   :  { %v1868_v23 = vpop.f32.mrf.mxu0 }
 0x466   :  { %v1875_v24 = vpop.f32.mrf.mxu1  ;;  %v1569_v25 = vadd.f32 %v1565_v21, %v1492_v22 }
 0x467   :  { %v1642_v26 = vpop.f32.mrf.mxu0 }
 0x468   :  { %v1646_v27 = vadd.f32 %v1642_v26, %v1569_v25 }
 0x469   :  { %v1882_v29 = vpop.f32.mrf.mxu0 }
 0x46a   :  { %v1647_v30 = vmax.f32 %v1646_v27, 0.0 }
 0x46c   :  { %v1649_v31 = vrot.slane %v1647_v30, 2 }
 0x46e   :  { %v1651_v32 = vmax.f32 %v1647_v30, %v1649_v31 }
 0x470   :  { %v1654_v33 = vsel %vm69_vm0, %v1651_v32, 0.0  ;;  %v1662_v0 = vmul.f32 %v1651_v32, %v1651_v32 }
 0x471   :  { %v1655_v34 = vrot.slane %v1654_v33, 4 }
 0x472   :  { %v1663_v35 = vsel %vm69_vm0, %v1662_v0, 0.0 }
 0x473   :  { %v1656_v36 = vadd.f32 %v1655_v34, %v1654_v33  ;;  %v1664_v37 = vrot.slane %v1663_v35, 4 }
 0x475   :  { %v1657_v38 = vrot.slane %v1656_v36, 2  ;;  %v1665_v40 = vadd.f32 %v1664_v37, %v1663_v35 }
 0x477   :  { %v1658_v39 = vadd.f32 %v1657_v38, %v1656_v36  ;;  %v1666_v41 = vrot.slane %v1665_v40, 2 }
 0x479   :  { %v1659_v51 = vrot.slane %v1658_v39, 1  ;;  %v1667_v42 = vadd.f32 %v1666_v41, %v1665_v40 }
 0x47b   :  { %v1660_v43 = vadd.f32 %v1659_v51, %v1658_v39  ;;  %v1668_v44 = vrot.slane %v1667_v42, 1 }
 0x47d   :  { %v1669_v45 = vadd.f32 %v1668_v44, %v1667_v42  ;;  %v1672_v46 = vmul.f32 0.5, %v1660_v43 }
 0x47f   :  { %v1673_v47 = vmul.f32 0.5, %v1669_v45  ;;  %v1674_v48 = vmul.f32 %v1672_v46, %v1672_v46 }
 0x481   :  { %v1675_v49 = vsub.f32 %v1673_v47, %v1674_v48 }
 0x483   :  { %v1676_v50 = vmax.f32 %v1675_v49, 0.0 }
 0x485   :  { %v1677_v52 = vadd.f32 1e-05, %v1676_v50 }
 0x487   :  { %1902 = vrsqrt.f32 %v1677_v52 }
 0x494   :  { %v1903_v54 = vpop.eup %1902 }
 0x495   :  { %v1679_v55 = vmul.f32 %v1903_v54, %v1652_v53 }
 0x497   :  { %v1680_v57 = vmul.f32 %v1679_v55, %v1672_v46  ;;  %v1685_v58 = vrot.slane %v1679_v55, %v1974_v28 }
 0x499   :  { %v1681_v59 = vsub.f32 %v1653_v56, %v1680_v57  ;;  %v1686_v60 = vmul.f32 %v1685_v58, %v1651_v32 }
 0x49b   :  { %v1690_v61 = vrot.slane %v1681_v59, %v1974_v28 }
 0x49d   :  { %v1691_v62 = vadd.f32 %v1690_v61, %v1686_v60 }
 0x49f   :  { %1692 = vst.msk [vmem:[%s2131_s2] sm:$0x3] %vm69_vm0, %v1691_v62 }
 0x4a0   :  { %1697 = vsyncpa [#allocation4], 1 }

</bundles_post_ra>
